<compile_context>
chip_gen: v7x
topology: tpu7x:2x2x1
jax: 0.10.0
libtpu: 0.0.40
codegen_flags: <defaults>
</compile_context>

<pallas_src>
import functools

import jax
import jax.numpy as jnp
from jax import lax
from jax.experimental import pallas as pl
from jax.experimental.pallas import tpu as pltpu


# ----------------------------------------------------------------------------
# Fused Pallas kernel: MHGAT -> fc -> gc1 -> (gc2|gc3) -> inner-product decoder
# One grid step == one graph.
# ----------------------------------------------------------------------------

def _fused_vae_kernel(x_ref, adj_ref, watt_ref, aatt_ref, fcw_ref, fcb_ref,
                      gc1w_ref, gc23w_ref,
                      rec_ref, mulv_ref,
                      *, alpha, nheads, f_out, h2):
    x = x_ref[...]                         # (N, F_in)
    adj = adj_ref[...]                     # (N, N)
    adj_mask = adj > 0.0                   # shared by all heads

    # ---- MHGAT: all heads' Wh in one lane-dense matmul ----------------------
    # watt_ref is the per-head W matrices concatenated along the output axis.
    wh_all = jnp.dot(x, watt_ref[...], preferred_element_type=jnp.float32)  # (N, nh*Fo)

    hps = []
    for h in range(nheads):                # nheads is small & static -> unrolled
        wh = wh_all[:, h * f_out:(h + 1) * f_out]                 # (N, Fo)
        a1 = aatt_ref[h:h + 1, :f_out]                            # (1, Fo)
        a2 = aatt_ref[h:h + 1, f_out:]                            # (1, Fo)

        # first logit as a (N,1) column (VPU mul + reduce)
        e1 = jnp.sum(wh * a1, axis=1, keepdims=True)              # (N, 1)
        # second logit computed directly as a (1, N) row: contract Fo of both
        # operands -> no explicit (N,1)->(1,N) transpose on the XLU.
        e2 = lax.dot_general(a2, wh, (((1,), (1,)), ((), ())),
                             preferred_element_type=jnp.float32)  # (1, N)
        e = e1 + e2                                               # (N, N)
        e = jnp.where(e > 0, e, alpha * e)                        # LeakyReLU
        e = jnp.where(adj_mask, e, jnp.float32(-9e15))            # mask non-edges

        # row-wise softmax (EUP exp + approx reciprocal; use approx=False for
        # bit-tight parity against the PyTorch softmax)
        e = e - jnp.max(e, axis=1, keepdims=True)
        p = jnp.exp(e)
        att = p * pl.reciprocal(jnp.sum(p, axis=1, keepdims=True), approx=True)

        hp = jnp.dot(att, wh, preferred_element_type=jnp.float32)  # (N, Fo)
        # ELU (concat=True path); exp only on the non-positive branch
        hp = jnp.where(hp > 0, hp, jnp.exp(jnp.minimum(hp, 0.0)) - 1.0)
        hps.append(hp)

    # fc(cat(heads)): one K = nheads*Fo matmul instead of nheads K=Fo matmuls + adds
    hp_all = jnp.concatenate(hps, axis=1)                          # (N, nheads*Fo)
    x_gat = jnp.dot(hp_all, fcw_ref[...],
                    preferred_element_type=jnp.float32) + fcb_ref[...]   # (N, F_in)

    # ---- GCN encoder ---------------------------------------------------------
    h1 = jnp.dot(adj,
                 jnp.dot(x_gat, gc1w_ref[...], preferred_element_type=jnp.float32),
                 preferred_element_type=jnp.float32)               # (N, H1)
    h1 = jnp.maximum(h1, 0.0)                                      # relu

    # gc2 and gc3 fused: one support matmul + one adj pass; single lane-dense store
    mulv = jnp.dot(adj,
                   jnp.dot(h1, gc23w_ref[...], preferred_element_type=jnp.float32),
                   preferred_element_type=jnp.float32)             # (N, 2*H2)
    mulv_ref[...] = mulv

    # ---- inner-product decoder (z = mu in eval mode, identity act) -----------
    # dim-1/dim-1 contraction == mu @ mu.T without an explicit transpose.
    mu = mulv[:, :h2]
    rec_ref[...] = lax.dot_general(mu, mu, (((1,), (1,)), ((), ())),
                                   preferred_element_type=jnp.float32)


# ----------------------------------------------------------------------------
# Wrapper
# ----------------------------------------------------------------------------

def pack_params(params):
    """One-time repacking of tiny parameter tensors into kernel-friendly layouts."""
    nheads, f_in, f_out = params["att_w"].shape
    return {
        # (F_in, nheads*F_out): per-head W concatenated along the output axis
        "att_w_all": jnp.transpose(params["att_w"], (1, 0, 2)).reshape(f_in, nheads * f_out),
        # (nheads, 2*F_out)
        "att_a": params["att_a"].reshape(nheads, 2 * f_out),
        "fc_w": params["fc_w"],
        "fc_b": params["fc_b"].reshape(1, -1),
        "gc1_w": params["gc1_w"],
        # (H1, 2*H2): gc2 | gc3 fused
        "gc23_w": jnp.concatenate([params["gc2_w"], params["gc3_w"]], axis=1),
        "nheads": nheads,
        "f_out": f_out,
        "h2": params["gc2_w"].shape[1],
    }


def _cost_estimate(b, n, f_in, f_out, nheads, h1, h2):
    per_graph_flops = (
        2 * n * f_in * nheads * f_out                 # wh_all
        + nheads * (4 * n * f_out)                    # e1, e2 logits
        + nheads * (2 * n * n * f_out)                # att @ wh
        + 2 * n * (nheads * f_out) * f_in             # fc
        + 2 * n * f_in * h1 + 2 * n * n * h1          # gc1 support + adj pass
        + 2 * n * h1 * (2 * h2) + 2 * n * n * (2 * h2)  # gc2|gc3 support + adj pass
        + 2 * n * n * h2                              # decoder
    )
    per_graph_trans = nheads * (n * n + n * f_out + n)   # softmax exp, ELU exp, reciprocal
    per_graph_bytes = 4 * (n * f_in + n * n + n * n + n * 2 * h2)   # x, adj, rec, mu|logvar
    weight_bytes = 4 * (f_in * nheads * f_out + nheads * 2 * f_out
                        + nheads * f_out * f_in + f_in + f_in * h1 + h1 * 2 * h2)
    return pl.CostEstimate(flops=b * per_graph_flops,
                           transcendentals=b * per_graph_trans,
                           bytes_accessed=b * per_graph_bytes + weight_bytes)


def gcn_model_vae_forward(x, adj, packed, alpha):
    """x: (B, N, F_in), adj: (B, N, N) dense normalized adjacency. Eval-mode forward."""
    b, n, f_in = x.shape
    nheads, f_out, h2 = packed["nheads"], packed["f_out"], packed["h2"]
    h1 = packed["gc1_w"].shape[1]

    kernel = functools.partial(_fused_vae_kernel, alpha=alpha,
                               nheads=nheads, f_out=f_out, h2=h2)

    def graph_spec(shape):
        # one graph-sized slab per grid step; leading batch dim squeezed out
        return pl.BlockSpec((None,) + shape, lambda i, s=shape: (i,) + (0,) * len(s))

    def weight_spec(arr):
        # grid-invariant block index -> weights stay VMEM-resident across the grid
        return pl.BlockSpec(arr.shape, lambda i, nd=arr.ndim: (0,) * nd)

    rec, mulv = pl.pallas_call(
        kernel,
        grid=(b,),
        in_specs=(
            graph_spec((n, f_in)),                 # x
            graph_spec((n, n)),                    # adj
            weight_spec(packed["att_w_all"]),
            weight_spec(packed["att_a"]),
            weight_spec(packed["fc_w"]),
            weight_spec(packed["fc_b"]),
            weight_spec(packed["gc1_w"]),
            weight_spec(packed["gc23_w"]),
        ),
        out_specs=(
            graph_spec((n, n)),                    # rec
            graph_spec((n, 2 * h2)),               # mu | logvar (single lane-dense slab)
        ),
        out_shape=(
            jax.ShapeDtypeStruct((b, n, n), jnp.float32),
            jax.ShapeDtypeStruct((b, n, 2 * h2), jnp.float32),
        ),
        compiler_params=pltpu.CompilerParams(
            dimension_semantics=("parallel",),
            vmem_limit_bytes=32 * 1024 * 1024,
        ),
        cost_estimate=_cost_estimate(b, n, f_in, f_out, nheads, h1, h2),
    )(x, adj, packed["att_w_all"], packed["att_a"], packed["fc_w"],
      packed["fc_b"], packed["gc1_w"], packed["gc23_w"])

    mu = mulv[:, :, :h2]
    logvar = mulv[:, :, h2:]
    return rec, mu, logvar


# ----------------------------------------------------------------------------
# Deterministic parameter / input construction and smoke test
# ----------------------------------------------------------------------------

def init_params(key, input_feat_dim, hidden_dim1, hidden_dim2, nheads):
    output_feat_dim = input_feat_dim  # as in GCNModelVAE.__init__
    keys = jax.random.split(key, 7)
    s = 0.1
    return {
        "att_w": s * jax.random.normal(keys[0], (nheads, input_feat_dim, output_feat_dim), jnp.float32),
        "att_a": s * jax.random.normal(keys[1], (nheads, 2 * output_feat_dim, 1), jnp.float32),
        "fc_w": s * jax.random.normal(keys[2], (output_feat_dim * nheads, input_feat_dim), jnp.float32),
        "fc_b": s * jax.random.normal(keys[3], (input_feat_dim,), jnp.float32),
        "gc1_w": s * jax.random.normal(keys[4], (input_feat_dim, hidden_dim1), jnp.float32),
        "gc2_w": s * jax.random.normal(keys[5], (hidden_dim1, hidden_dim2), jnp.float32),
        "gc3_w": s * jax.random.normal(keys[6], (hidden_dim1, hidden_dim2), jnp.float32),
    }


def make_adj(key, n):
    """Symmetric normalized adjacency with self-loops (GAE-style)."""
    a = (jax.random.uniform(key, (n, n)) < 0.3).astype(jnp.float32)
    a = jnp.maximum(a, a.T)
    a = a + jnp.eye(n, dtype=jnp.float32)
    a = jnp.minimum(a, 1.0)
    d = jnp.sum(a, axis=1)
    d_inv_sqrt = 1.0 / jnp.sqrt(d)
    return a * d_inv_sqrt[:, None] * d_inv_sqrt[None, :]


if __name__ == "__main__":
    B = 8                  # batch of independent graphs (grid axis, "parallel")
    N = 16                 # number of graph nodes
    INPUT_FEAT_DIM = 16
    HIDDEN_DIM1 = 32
    HIDDEN_DIM2 = 16
    NHEADS = 4
    ALPHA = 0.2
    # dropout = 0.0 / eval mode -> dropout is identity

    root = jax.random.PRNGKey(0)
    k_x, k_adj, k_p = jax.random.split(root, 3)

    x = jax.random.normal(k_x, (B, N, INPUT_FEAT_DIM), jnp.float32)
    adj = jnp.stack([make_adj(k, N) for k in jax.random.split(k_adj, B)])
    params = init_params(k_p, INPUT_FEAT_DIM, HIDDEN_DIM1, HIDDEN_DIM2, NHEADS)
    packed = pack_params(params)

    adj_rec, mu, logvar = gcn_model_vae_forward(x, adj, packed, ALPHA)
    jax.block_until_ready((adj_rec, mu, logvar))

    assert adj_rec.shape == (B, N, N)
    assert mu.shape == (B, N, HIDDEN_DIM2)
    assert logvar.shape == (B, N, HIDDEN_DIM2)
    assert bool(jnp.all(jnp.isfinite(adj_rec)))
    assert bool(jnp.all(jnp.isfinite(mu)))
    assert bool(jnp.all(jnp.isfinite(logvar)))
    print("KERNEL_OK")
</pallas_src>

<mosaic_0001>
module attributes {stable_mosaic.version = 11 : i64} {
  func.func @_fused_vae_kernel(%arg0: i32, %arg1: memref<1x16x16xf32, #tpu.memory_space<vmem>>, %arg2: memref<1x16x16xf32, #tpu.memory_space<vmem>>, %arg3: memref<16x64xf32, #tpu.memory_space<vmem>>, %arg4: memref<4x32xf32, #tpu.memory_space<vmem>>, %arg5: memref<64x16xf32, #tpu.memory_space<vmem>>, %arg6: memref<1x16xf32, #tpu.memory_space<vmem>>, %arg7: memref<16x32xf32, #tpu.memory_space<vmem>>, %arg8: memref<32x32xf32, #tpu.memory_space<vmem>>, %arg9: memref<1x16x16xf32, #tpu.memory_space<vmem>>, %arg10: memref<1x16x32xf32, #tpu.memory_space<vmem>>) attributes {dimension_semantics = [#tpu.dimension_semantics<parallel>], iteration_bounds = array<i64: 8>, scalar_prefetch = 0 : i64, scratch_operands = 0 : i64, tpu.core_type = #tpu.core_type<tc>, window_params = [{transform_indices = @transform_0, window_bounds = array<i64: 1, 16, 16>}, {transform_indices = @transform_1, window_bounds = array<i64: 1, 16, 16>}, {pipeline_mode = #tpu.pipeline_mode<synchronous>, transform_indices = @transform_2, window_bounds = array<i64: 16, 64>}, {pipeline_mode = #tpu.pipeline_mode<synchronous>, transform_indices = @transform_3, window_bounds = array<i64: 4, 32>}, {pipeline_mode = #tpu.pipeline_mode<synchronous>, transform_indices = @transform_4, window_bounds = array<i64: 64, 16>}, {pipeline_mode = #tpu.pipeline_mode<synchronous>, transform_indices = @transform_5, window_bounds = array<i64: 1, 16>}, {pipeline_mode = #tpu.pipeline_mode<synchronous>, transform_indices = @transform_6, window_bounds = array<i64: 16, 32>}, {pipeline_mode = #tpu.pipeline_mode<synchronous>, transform_indices = @transform_7, window_bounds = array<i64: 32, 32>}, {transform_indices = @transform_8, window_bounds = array<i64: 1, 16, 16>}, {transform_indices = @transform_9, window_bounds = array<i64: 1, 16, 32>}]} {
    %c0 = arith.constant 0 : index
    %c0_0 = arith.constant 0 : index
    %c0_1 = arith.constant 0 : index
    %0 = vector.load %arg1[%c0, %c0_0, %c0_1] : memref<1x16x16xf32, #tpu.memory_space<vmem>>, vector<1x16x16xf32>
    %1 = vector.shape_cast %0 : vector<1x16x16xf32> to vector<16x16xf32>
    %c0_2 = arith.constant 0 : index
    %c0_3 = arith.constant 0 : index
    %c0_4 = arith.constant 0 : index
    %2 = vector.load %arg2[%c0_2, %c0_3, %c0_4] : memref<1x16x16xf32, #tpu.memory_space<vmem>>, vector<1x16x16xf32>
    %3 = vector.shape_cast %2 : vector<1x16x16xf32> to vector<16x16xf32>
    %cst = arith.constant 0.000000e+00 : f32
    %4 = vector.broadcast %cst : f32 to vector<16x16xf32>
    %5 = arith.cmpf ogt, %3, %4 : vector<16x16xf32>
    %c0_5 = arith.constant 0 : index
    %c0_6 = arith.constant 0 : index
    %6 = vector.load %arg3[%c0_5, %c0_6] : memref<16x64xf32, #tpu.memory_space<vmem>>, vector<16x64xf32>
    %cst_7 = arith.constant dense<0.000000e+00> : vector<16x64xf32>
    %7 = tpu.matmul %1, %6, %cst_7 {dimension_numbers = #tpu.dot_dimension_numbers<[1], [0], [0], [1], [0, 0, 1, 1], [], []>} : vector<16x16xf32>, vector<16x64xf32>, vector<16x64xf32> -> vector<16x64xf32>
    %8 = vector.extract_strided_slice %7 {offsets = [0, 0], sizes = [16, 16], strides = [1, 1]} : vector<16x64xf32> to vector<16x16xf32>
    %c0_8 = arith.constant 0 : index
    %c0_9 = arith.constant 0 : index
    %9 = vector.load %arg4[%c0_8, %c0_9] : memref<4x32xf32, #tpu.memory_space<vmem>>, vector<1x16xf32>
    %c0_10 = arith.constant 0 : index
    %c16 = arith.constant 16 : index
    %10 = vector.load %arg4[%c0_10, %c16] : memref<4x32xf32, #tpu.memory_space<vmem>>, vector<1x16xf32>
    %11 = vector.broadcast %9 : vector<1x16xf32> to vector<16x16xf32>
    %12 = arith.mulf %8, %11 : vector<16x16xf32>
    %cst_11 = arith.constant dense<0.000000e+00> : vector<16xf32>
    %13 = vector.multi_reduction <add>, %12, %cst_11 [1] : vector<16x16xf32> to vector<16xf32>
    %14 = vector.shape_cast %13 : vector<16xf32> to vector<16x1xf32>
    %cst_12 = arith.constant dense<0.000000e+00> : vector<1x16xf32>
    %15 = tpu.matmul %10, %8, %cst_12 {dimension_numbers = #tpu.dot_dimension_numbers<[1], [1], [0], [0], [0, 0, 1, 0], [], []>} : vector<1x16xf32>, vector<16x16xf32>, vector<1x16xf32> -> vector<1x16xf32>
    %16 = vector.broadcast %14 : vector<16x1xf32> to vector<16x16xf32>
    %17 = vector.broadcast %15 : vector<1x16xf32> to vector<16x16xf32>
    %18 = arith.addf %16, %17 : vector<16x16xf32>
    %cst_13 = arith.constant 0.000000e+00 : f32
    %19 = vector.broadcast %cst_13 : f32 to vector<16x16xf32>
    %20 = arith.cmpf ogt, %18, %19 : vector<16x16xf32>
    %cst_14 = arith.constant 2.000000e-01 : f32
    %21 = vector.broadcast %cst_14 : f32 to vector<16x16xf32>
    %22 = arith.mulf %21, %18 : vector<16x16xf32>
    %23 = arith.select %20, %18, %22 : vector<16x16xi1>, vector<16x16xf32>
    %cst_15 = arith.constant -9.000000e+15 : f32
    %24 = vector.broadcast %cst_15 : f32 to vector<16x16xf32>
    %25 = arith.select %5, %23, %24 : vector<16x16xi1>, vector<16x16xf32>
    %cst_16 = arith.constant dense<0xFF800000> : vector<16xf32>
    %26 = vector.multi_reduction <maximumf>, %25, %cst_16 [1] : vector<16x16xf32> to vector<16xf32>
    %27 = vector.shape_cast %26 : vector<16xf32> to vector<16x1xf32>
    %28 = vector.broadcast %27 : vector<16x1xf32> to vector<16x16xf32>
    %29 = arith.subf %25, %28 : vector<16x16xf32>
    %30 = math.exp %29 : vector<16x16xf32>
    %cst_17 = arith.constant dense<0.000000e+00> : vector<16xf32>
    %31 = vector.multi_reduction <add>, %30, %cst_17 [1] : vector<16x16xf32> to vector<16xf32>
    %32 = vector.shape_cast %31 : vector<16xf32> to vector<16x1xf32>
    %33 = tpu.reciprocal %32 {approx = true} : vector<16x1xf32> -> vector<16x1xf32>
    %34 = vector.broadcast %33 : vector<16x1xf32> to vector<16x16xf32>
    %35 = arith.mulf %30, %34 : vector<16x16xf32>
    %cst_18 = arith.constant dense<0.000000e+00> : vector<16x16xf32>
    %36 = tpu.matmul %35, %8, %cst_18 {dimension_numbers = #tpu.dot_dimension_numbers<[1], [0], [0], [1], [0, 0, 1, 1], [], []>} : vector<16x16xf32>, vector<16x16xf32>, vector<16x16xf32> -> vector<16x16xf32>
    %cst_19 = arith.constant 0.000000e+00 : f32
    %37 = vector.broadcast %cst_19 : f32 to vector<16x16xf32>
    %38 = arith.cmpf ogt, %36, %37 : vector<16x16xf32>
    %cst_20 = arith.constant 0.000000e+00 : f32
    %39 = vector.broadcast %cst_20 : f32 to vector<16x16xf32>
    %40 = arith.minimumf %36, %39 : vector<16x16xf32>
    %41 = math.exp %40 : vector<16x16xf32>
    %cst_21 = arith.constant 1.000000e+00 : f32
    %42 = vector.broadcast %cst_21 : f32 to vector<16x16xf32>
    %43 = arith.subf %41, %42 : vector<16x16xf32>
    %44 = arith.select %38, %36, %43 : vector<16x16xi1>, vector<16x16xf32>
    %45 = vector.extract_strided_slice %7 {offsets = [0, 16], sizes = [16, 16], strides = [1, 1]} : vector<16x64xf32> to vector<16x16xf32>
    %c1 = arith.constant 1 : index
    %c0_22 = arith.constant 0 : index
    %46 = vector.load %arg4[%c1, %c0_22] : memref<4x32xf32, #tpu.memory_space<vmem>>, vector<1x16xf32>
    %c1_23 = arith.constant 1 : index
    %c16_24 = arith.constant 16 : index
    %47 = vector.load %arg4[%c1_23, %c16_24] : memref<4x32xf32, #tpu.memory_space<vmem>>, vector<1x16xf32>
    %48 = vector.broadcast %46 : vector<1x16xf32> to vector<16x16xf32>
    %49 = arith.mulf %45, %48 : vector<16x16xf32>
    %cst_25 = arith.constant dense<0.000000e+00> : vector<16xf32>
    %50 = vector.multi_reduction <add>, %49, %cst_25 [1] : vector<16x16xf32> to vector<16xf32>
    %51 = vector.shape_cast %50 : vector<16xf32> to vector<16x1xf32>
    %cst_26 = arith.constant dense<0.000000e+00> : vector<1x16xf32>
    %52 = tpu.matmul %47, %45, %cst_26 {dimension_numbers = #tpu.dot_dimension_numbers<[1], [1], [0], [0], [0, 0, 1, 0], [], []>} : vector<1x16xf32>, vector<16x16xf32>, vector<1x16xf32> -> vector<1x16xf32>
    %53 = vector.broadcast %51 : vector<16x1xf32> to vector<16x16xf32>
    %54 = vector.broadcast %52 : vector<1x16xf32> to vector<16x16xf32>
    %55 = arith.addf %53, %54 : vector<16x16xf32>
    %cst_27 = arith.constant 0.000000e+00 : f32
    %56 = vector.broadcast %cst_27 : f32 to vector<16x16xf32>
    %57 = arith.cmpf ogt, %55, %56 : vector<16x16xf32>
    %cst_28 = arith.constant 2.000000e-01 : f32
    %58 = vector.broadcast %cst_28 : f32 to vector<16x16xf32>
    %59 = arith.mulf %58, %55 : vector<16x16xf32>
    %60 = arith.select %57, %55, %59 : vector<16x16xi1>, vector<16x16xf32>
    %cst_29 = arith.constant -9.000000e+15 : f32
    %61 = vector.broadcast %cst_29 : f32 to vector<16x16xf32>
    %62 = arith.select %5, %60, %61 : vector<16x16xi1>, vector<16x16xf32>
    %cst_30 = arith.constant dense<0xFF800000> : vector<16xf32>
    %63 = vector.multi_reduction <maximumf>, %62, %cst_30 [1] : vector<16x16xf32> to vector<16xf32>
    %64 = vector.shape_cast %63 : vector<16xf32> to vector<16x1xf32>
    %65 = vector.broadcast %64 : vector<16x1xf32> to vector<16x16xf32>
    %66 = arith.subf %62, %65 : vector<16x16xf32>
    %67 = math.exp %66 : vector<16x16xf32>
    %cst_31 = arith.constant dense<0.000000e+00> : vector<16xf32>
    %68 = vector.multi_reduction <add>, %67, %cst_31 [1] : vector<16x16xf32> to vector<16xf32>
    %69 = vector.shape_cast %68 : vector<16xf32> to vector<16x1xf32>
    %70 = tpu.reciprocal %69 {approx = true} : vector<16x1xf32> -> vector<16x1xf32>
    %71 = vector.broadcast %70 : vector<16x1xf32> to vector<16x16xf32>
    %72 = arith.mulf %67, %71 : vector<16x16xf32>
    %cst_32 = arith.constant dense<0.000000e+00> : vector<16x16xf32>
    %73 = tpu.matmul %72, %45, %cst_32 {dimension_numbers = #tpu.dot_dimension_numbers<[1], [0], [0], [1], [0, 0, 1, 1], [], []>} : vector<16x16xf32>, vector<16x16xf32>, vector<16x16xf32> -> vector<16x16xf32>
    %cst_33 = arith.constant 0.000000e+00 : f32
    %74 = vector.broadcast %cst_33 : f32 to vector<16x16xf32>
    %75 = arith.cmpf ogt, %73, %74 : vector<16x16xf32>
    %cst_34 = arith.constant 0.000000e+00 : f32
    %76 = vector.broadcast %cst_34 : f32 to vector<16x16xf32>
    %77 = arith.minimumf %73, %76 : vector<16x16xf32>
    %78 = math.exp %77 : vector<16x16xf32>
    %cst_35 = arith.constant 1.000000e+00 : f32
    %79 = vector.broadcast %cst_35 : f32 to vector<16x16xf32>
    %80 = arith.subf %78, %79 : vector<16x16xf32>
    %81 = arith.select %75, %73, %80 : vector<16x16xi1>, vector<16x16xf32>
    %82 = vector.extract_strided_slice %7 {offsets = [0, 32], sizes = [16, 16], strides = [1, 1]} : vector<16x64xf32> to vector<16x16xf32>
    %c2 = arith.constant 2 : index
    %c0_36 = arith.constant 0 : index
    %83 = vector.load %arg4[%c2, %c0_36] : memref<4x32xf32, #tpu.memory_space<vmem>>, vector<1x16xf32>
    %c2_37 = arith.constant 2 : index
    %c16_38 = arith.constant 16 : index
    %84 = vector.load %arg4[%c2_37, %c16_38] : memref<4x32xf32, #tpu.memory_space<vmem>>, vector<1x16xf32>
    %85 = vector.broadcast %83 : vector<1x16xf32> to vector<16x16xf32>
    %86 = arith.mulf %82, %85 : vector<16x16xf32>
    %cst_39 = arith.constant dense<0.000000e+00> : vector<16xf32>
    %87 = vector.multi_reduction <add>, %86, %cst_39 [1] : vector<16x16xf32> to vector<16xf32>
    %88 = vector.shape_cast %87 : vector<16xf32> to vector<16x1xf32>
    %cst_40 = arith.constant dense<0.000000e+00> : vector<1x16xf32>
    %89 = tpu.matmul %84, %82, %cst_40 {dimension_numbers = #tpu.dot_dimension_numbers<[1], [1], [0], [0], [0, 0, 1, 0], [], []>} : vector<1x16xf32>, vector<16x16xf32>, vector<1x16xf32> -> vector<1x16xf32>
    %90 = vector.broadcast %88 : vector<16x1xf32> to vector<16x16xf32>
    %91 = vector.broadcast %89 : vector<1x16xf32> to vector<16x16xf32>
    %92 = arith.addf %90, %91 : vector<16x16xf32>
    %cst_41 = arith.constant 0.000000e+00 : f32
    %93 = vector.broadcast %cst_41 : f32 to vector<16x16xf32>
    %94 = arith.cmpf ogt, %92, %93 : vector<16x16xf32>
    %cst_42 = arith.constant 2.000000e-01 : f32
    %95 = vector.broadcast %cst_42 : f32 to vector<16x16xf32>
    %96 = arith.mulf %95, %92 : vector<16x16xf32>
    %97 = arith.select %94, %92, %96 : vector<16x16xi1>, vector<16x16xf32>
    %cst_43 = arith.constant -9.000000e+15 : f32
    %98 = vector.broadcast %cst_43 : f32 to vector<16x16xf32>
    %99 = arith.select %5, %97, %98 : vector<16x16xi1>, vector<16x16xf32>
    %cst_44 = arith.constant dense<0xFF800000> : vector<16xf32>
    %100 = vector.multi_reduction <maximumf>, %99, %cst_44 [1] : vector<16x16xf32> to vector<16xf32>
    %101 = vector.shape_cast %100 : vector<16xf32> to vector<16x1xf32>
    %102 = vector.broadcast %101 : vector<16x1xf32> to vector<16x16xf32>
    %103 = arith.subf %99, %102 : vector<16x16xf32>
    %104 = math.exp %103 : vector<16x16xf32>
    %cst_45 = arith.constant dense<0.000000e+00> : vector<16xf32>
    %105 = vector.multi_reduction <add>, %104, %cst_45 [1] : vector<16x16xf32> to vector<16xf32>
    %106 = vector.shape_cast %105 : vector<16xf32> to vector<16x1xf32>
    %107 = tpu.reciprocal %106 {approx = true} : vector<16x1xf32> -> vector<16x1xf32>
    %108 = vector.broadcast %107 : vector<16x1xf32> to vector<16x16xf32>
    %109 = arith.mulf %104, %108 : vector<16x16xf32>
    %cst_46 = arith.constant dense<0.000000e+00> : vector<16x16xf32>
    %110 = tpu.matmul %109, %82, %cst_46 {dimension_numbers = #tpu.dot_dimension_numbers<[1], [0], [0], [1], [0, 0, 1, 1], [], []>} : vector<16x16xf32>, vector<16x16xf32>, vector<16x16xf32> -> vector<16x16xf32>
    %cst_47 = arith.constant 0.000000e+00 : f32
    %111 = vector.broadcast %cst_47 : f32 to vector<16x16xf32>
    %112 = arith.cmpf ogt, %110, %111 : vector<16x16xf32>
    %cst_48 = arith.constant 0.000000e+00 : f32
    %113 = vector.broadcast %cst_48 : f32 to vector<16x16xf32>
    %114 = arith.minimumf %110, %113 : vector<16x16xf32>
    %115 = math.exp %114 : vector<16x16xf32>
    %cst_49 = arith.constant 1.000000e+00 : f32
    %116 = vector.broadcast %cst_49 : f32 to vector<16x16xf32>
    %117 = arith.subf %115, %116 : vector<16x16xf32>
    %118 = arith.select %112, %110, %117 : vector<16x16xi1>, vector<16x16xf32>
    %119 = vector.extract_strided_slice %7 {offsets = [0, 48], sizes = [16, 16], strides = [1, 1]} : vector<16x64xf32> to vector<16x16xf32>
    %c3 = arith.constant 3 : index
    %c0_50 = arith.constant 0 : index
    %120 = vector.load %arg4[%c3, %c0_50] : memref<4x32xf32, #tpu.memory_space<vmem>>, vector<1x16xf32>
    %c3_51 = arith.constant 3 : index
    %c16_52 = arith.constant 16 : index
    %121 = vector.load %arg4[%c3_51, %c16_52] : memref<4x32xf32, #tpu.memory_space<vmem>>, vector<1x16xf32>
    %122 = vector.broadcast %120 : vector<1x16xf32> to vector<16x16xf32>
    %123 = arith.mulf %119, %122 : vector<16x16xf32>
    %cst_53 = arith.constant dense<0.000000e+00> : vector<16xf32>
    %124 = vector.multi_reduction <add>, %123, %cst_53 [1] : vector<16x16xf32> to vector<16xf32>
    %125 = vector.shape_cast %124 : vector<16xf32> to vector<16x1xf32>
    %cst_54 = arith.constant dense<0.000000e+00> : vector<1x16xf32>
    %126 = tpu.matmul %121, %119, %cst_54 {dimension_numbers = #tpu.dot_dimension_numbers<[1], [1], [0], [0], [0, 0, 1, 0], [], []>} : vector<1x16xf32>, vector<16x16xf32>, vector<1x16xf32> -> vector<1x16xf32>
    %127 = vector.broadcast %125 : vector<16x1xf32> to vector<16x16xf32>
    %128 = vector.broadcast %126 : vector<1x16xf32> to vector<16x16xf32>
    %129 = arith.addf %127, %128 : vector<16x16xf32>
    %cst_55 = arith.constant 0.000000e+00 : f32
    %130 = vector.broadcast %cst_55 : f32 to vector<16x16xf32>
    %131 = arith.cmpf ogt, %129, %130 : vector<16x16xf32>
    %cst_56 = arith.constant 2.000000e-01 : f32
    %132 = vector.broadcast %cst_56 : f32 to vector<16x16xf32>
    %133 = arith.mulf %132, %129 : vector<16x16xf32>
    %134 = arith.select %131, %129, %133 : vector<16x16xi1>, vector<16x16xf32>
    %cst_57 = arith.constant -9.000000e+15 : f32
    %135 = vector.broadcast %cst_57 : f32 to vector<16x16xf32>
    %136 = arith.select %5, %134, %135 : vector<16x16xi1>, vector<16x16xf32>
    %cst_58 = arith.constant dense<0xFF800000> : vector<16xf32>
    %137 = vector.multi_reduction <maximumf>, %136, %cst_58 [1] : vector<16x16xf32> to vector<16xf32>
    %138 = vector.shape_cast %137 : vector<16xf32> to vector<16x1xf32>
    %139 = vector.broadcast %138 : vector<16x1xf32> to vector<16x16xf32>
    %140 = arith.subf %136, %139 : vector<16x16xf32>
    %141 = math.exp %140 : vector<16x16xf32>
    %cst_59 = arith.constant dense<0.000000e+00> : vector<16xf32>
    %142 = vector.multi_reduction <add>, %141, %cst_59 [1] : vector<16x16xf32> to vector<16xf32>
    %143 = vector.shape_cast %142 : vector<16xf32> to vector<16x1xf32>
    %144 = tpu.reciprocal %143 {approx = true} : vector<16x1xf32> -> vector<16x1xf32>
    %145 = vector.broadcast %144 : vector<16x1xf32> to vector<16x16xf32>
    %146 = arith.mulf %141, %145 : vector<16x16xf32>
    %cst_60 = arith.constant dense<0.000000e+00> : vector<16x16xf32>
    %147 = tpu.matmul %146, %119, %cst_60 {dimension_numbers = #tpu.dot_dimension_numbers<[1], [0], [0], [1], [0, 0, 1, 1], [], []>} : vector<16x16xf32>, vector<16x16xf32>, vector<16x16xf32> -> vector<16x16xf32>
    %cst_61 = arith.constant 0.000000e+00 : f32
    %148 = vector.broadcast %cst_61 : f32 to vector<16x16xf32>
    %149 = arith.cmpf ogt, %147, %148 : vector<16x16xf32>
    %cst_62 = arith.constant 0.000000e+00 : f32
    %150 = vector.broadcast %cst_62 : f32 to vector<16x16xf32>
    %151 = arith.minimumf %147, %150 : vector<16x16xf32>
    %152 = math.exp %151 : vector<16x16xf32>
    %cst_63 = arith.constant 1.000000e+00 : f32
    %153 = vector.broadcast %cst_63 : f32 to vector<16x16xf32>
    %154 = arith.subf %152, %153 : vector<16x16xf32>
    %155 = arith.select %149, %147, %154 : vector<16x16xi1>, vector<16x16xf32>
    %156 = tpu.concatenate %44, %81, %118, %155 in 1 : vector<16x16xf32>, vector<16x16xf32>, vector<16x16xf32>, vector<16x16xf32> -> vector<16x64xf32>
    %c0_64 = arith.constant 0 : index
    %c0_65 = arith.constant 0 : index
    %157 = vector.load %arg5[%c0_64, %c0_65] : memref<64x16xf32, #tpu.memory_space<vmem>>, vector<64x16xf32>
    %cst_66 = arith.constant dense<0.000000e+00> : vector<16x16xf32>
    %158 = tpu.matmul %156, %157, %cst_66 {dimension_numbers = #tpu.dot_dimension_numbers<[1], [0], [0], [1], [0, 0, 1, 1], [], []>} : vector<16x64xf32>, vector<64x16xf32>, vector<16x16xf32> -> vector<16x16xf32>
    %c0_67 = arith.constant 0 : index
    %c0_68 = arith.constant 0 : index
    %159 = vector.load %arg6[%c0_67, %c0_68] : memref<1x16xf32, #tpu.memory_space<vmem>>, vector<1x16xf32>
    %160 = vector.broadcast %159 : vector<1x16xf32> to vector<16x16xf32>
    %161 = arith.addf %158, %160 : vector<16x16xf32>
    %c0_69 = arith.constant 0 : index
    %c0_70 = arith.constant 0 : index
    %162 = vector.load %arg7[%c0_69, %c0_70] : memref<16x32xf32, #tpu.memory_space<vmem>>, vector<16x32xf32>
    %cst_71 = arith.constant dense<0.000000e+00> : vector<16x32xf32>
    %163 = tpu.matmul %161, %162, %cst_71 {dimension_numbers = #tpu.dot_dimension_numbers<[1], [0], [0], [1], [0, 0, 1, 1], [], []>} : vector<16x16xf32>, vector<16x32xf32>, vector<16x32xf32> -> vector<16x32xf32>
    %cst_72 = arith.constant dense<0.000000e+00> : vector<16x32xf32>
    %164 = tpu.matmul %3, %163, %cst_72 {dimension_numbers = #tpu.dot_dimension_numbers<[1], [0], [0], [1], [0, 0, 1, 1], [], []>} : vector<16x16xf32>, vector<16x32xf32>, vector<16x32xf32> -> vector<16x32xf32>
    %cst_73 = arith.constant 0.000000e+00 : f32
    %165 = vector.broadcast %cst_73 : f32 to vector<16x32xf32>
    %166 = arith.maximumf %164, %165 : vector<16x32xf32>
    %c0_74 = arith.constant 0 : index
    %c0_75 = arith.constant 0 : index
    %167 = vector.load %arg8[%c0_74, %c0_75] : memref<32x32xf32, #tpu.memory_space<vmem>>, vector<32x32xf32>
    %cst_76 = arith.constant dense<0.000000e+00> : vector<16x32xf32>
    %168 = tpu.matmul %166, %167, %cst_76 {dimension_numbers = #tpu.dot_dimension_numbers<[1], [0], [0], [1], [0, 0, 1, 1], [], []>} : vector<16x32xf32>, vector<32x32xf32>, vector<16x32xf32> -> vector<16x32xf32>
    %cst_77 = arith.constant dense<0.000000e+00> : vector<16x32xf32>
    %169 = tpu.matmul %3, %168, %cst_77 {dimension_numbers = #tpu.dot_dimension_numbers<[1], [0], [0], [1], [0, 0, 1, 1], [], []>} : vector<16x16xf32>, vector<16x32xf32>, vector<16x32xf32> -> vector<16x32xf32>
    %c0_78 = arith.constant 0 : index
    %c0_79 = arith.constant 0 : index
    %c0_80 = arith.constant 0 : index
    %170 = vector.load %arg10[%c0_78, %c0_79, %c0_80] : memref<1x16x32xf32, #tpu.memory_space<vmem>>, vector<1x16x32xf32>
    %171 = vector.shape_cast %170 : vector<1x16x32xf32> to vector<16x32xf32>
    %172 = vector.shape_cast %169 : vector<16x32xf32> to vector<1x16x32xf32>
    tpu.vector_store %arg10[%c0_78, %c0_79, %c0_80], %172 {strides = array<i32>} : memref<1x16x32xf32, #tpu.memory_space<vmem>>, vector<1x16x32xf32>,
    %173 = vector.extract_strided_slice %169 {offsets = [0, 0], sizes = [16, 16], strides = [1, 1]} : vector<16x32xf32> to vector<16x16xf32>
    %cst_81 = arith.constant dense<0.000000e+00> : vector<16x16xf32>
    %174 = tpu.matmul %173, %173, %cst_81 {dimension_numbers = #tpu.dot_dimension_numbers<[1], [1], [0], [0], [0, 0, 1, 0], [], []>} : vector<16x16xf32>, vector<16x16xf32>, vector<16x16xf32> -> vector<16x16xf32>
    %c0_82 = arith.constant 0 : index
    %c0_83 = arith.constant 0 : index
    %c0_84 = arith.constant 0 : index
    %175 = vector.load %arg9[%c0_82, %c0_83, %c0_84] : memref<1x16x16xf32, #tpu.memory_space<vmem>>, vector<1x16x16xf32>
    %176 = vector.shape_cast %175 : vector<1x16x16xf32> to vector<16x16xf32>
    %177 = vector.shape_cast %174 : vector<16x16xf32> to vector<1x16x16xf32>
    tpu.vector_store %arg9[%c0_82, %c0_83, %c0_84], %177 {strides = array<i32>} : memref<1x16x16xf32, #tpu.memory_space<vmem>>, vector<1x16x16xf32>,
    return
  }
  func.func @transform_0(%arg0: i32) -> (i32, i32, i32) {
    %c0_i32 = arith.constant 0 : i32
    %c0_i32_0 = arith.constant 0 : i32
    %c0_i32_1 = arith.constant 0 : i32
    return %arg0, %c0_i32, %c0_i32_0 : i32, i32, i32
  }
  func.func @transform_1(%arg0: i32) -> (i32, i32, i32) {
    %c0_i32 = arith.constant 0 : i32
    %c0_i32_0 = arith.constant 0 : i32
    %c0_i32_1 = arith.constant 0 : i32
    return %arg0, %c0_i32, %c0_i32_0 : i32, i32, i32
  }
  func.func @transform_2(%arg0: i32) -> (i32, i32) {
    %c0_i32 = arith.constant 0 : i32
    %c0_i32_0 = arith.constant 0 : i32
    %c0_i32_1 = arith.constant 0 : i32
    return %c0_i32, %c0_i32_0 : i32, i32
  }
  func.func @transform_3(%arg0: i32) -> (i32, i32) {
    %c0_i32 = arith.constant 0 : i32
    %c0_i32_0 = arith.constant 0 : i32
    %c0_i32_1 = arith.constant 0 : i32
    return %c0_i32, %c0_i32_0 : i32, i32
  }
  func.func @transform_4(%arg0: i32) -> (i32, i32) {
    %c0_i32 = arith.constant 0 : i32
    %c0_i32_0 = arith.constant 0 : i32
    %c0_i32_1 = arith.constant 0 : i32
    return %c0_i32, %c0_i32_0 : i32, i32
  }
  func.func @transform_5(%arg0: i32) -> (i32, i32) {
    %c0_i32 = arith.constant 0 : i32
    %c0_i32_0 = arith.constant 0 : i32
    %c0_i32_1 = arith.constant 0 : i32
    return %c0_i32, %c0_i32_0 : i32, i32
  }
  func.func @transform_6(%arg0: i32) -> (i32, i32) {
    %c0_i32 = arith.constant 0 : i32
    %c0_i32_0 = arith.constant 0 : i32
    %c0_i32_1 = arith.constant 0 : i32
    return %c0_i32, %c0_i32_0 : i32, i32
  }
  func.func @transform_7(%arg0: i32) -> (i32, i32) {
    %c0_i32 = arith.constant 0 : i32
    %c0_i32_0 = arith.constant 0 : i32
    %c0_i32_1 = arith.constant 0 : i32
    return %c0_i32, %c0_i32_0 : i32, i32
  }
  func.func @transform_8(%arg0: i32) -> (i32, i32, i32) {
    %c0_i32 = arith.constant 0 : i32
    %c0_i32_0 = arith.constant 0 : i32
    %c0_i32_1 = arith.constant 0 : i32
    return %arg0, %c0_i32, %c0_i32_0 : i32, i32, i32
  }
  func.func @transform_9(%arg0: i32) -> (i32, i32, i32) {
    %c0_i32 = arith.constant 0 : i32
    %c0_i32_0 = arith.constant 0 : i32
    %c0_i32_1 = arith.constant 0 : i32
    return %arg0, %c0_i32, %c0_i32_0 : i32, i32, i32
  }
}

</mosaic_0001>

<bundles_post_ra>
// kernel: tpu_custom_call.1
= control target key start
LH: loop header
LB: loop body
LE: loop exit
PB: predicated region body
PF: predicated region fallthrough
CT: control target
= control target key end

     0   :  { %s3351_s0 = inlined_call_operand.hbm [shape: f32[8,16,16], index: 0, kind: input, shape index: {}]   ;;  %s3352_s1 = inlined_call_operand.hbm [shape: f32[8,16,16], index: 1, kind: input, shape index: {}]   ;;  %s3353_s2 = inlined_call_operand.vmem [shape: f32[16,64], index: 2, kind: input, shape index: {}]   ;;  %s3354_s3 = inlined_call_operand.vmem [shape: f32[4,32], index: 3, kind: input, shape index: {}]   ;;  %s3355_s4 = inlined_call_operand.vmem [shape: f32[64,16], index: 4, kind: input, shape index: {}]   ;;  %s3356_s5 = inlined_call_operand.vmem [shape: f32[1,16], index: 5, kind: input, shape index: {}]   ;;  %s3357_s6 = inlined_call_operand.vmem [shape: f32[16,32], index: 6, kind: input, shape index: {}]   ;;  %s3358_s7 = inlined_call_operand.vmem [shape: f32[32,32], index: 7, kind: input, shape index: {}]   ;;  %s3359_s8 = inlined_call_operand.hbm [shape: f32[8,16,16], index: 8, kind: output, shape index: {0}]   ;;  %s3360_s9 = inlined_call_operand.hbm [shape: f32[8,16,32], index: 9, kind: output, shape index: {1}]  }
   0x1   :  { %3369 = sst [smem:[#allocation17_spill]] %s3351_s0 }
   0x2   :  { %15 = vsyncpa [#allocation3], 0 }
   0x3   :  { %17 = vsyncpa [#allocation3 + $0x1], 0 }
   0x4   :  { %18 = vsyncpa [#allocation6], 0 }
   0x5   :  { %20 = vsyncpa [#allocation6 + $0x1], 0 }
   0x6   :  { %21 = vsyncpa [#allocation4], 0 }
   0x7   :  { %23 = vsyncpa [#allocation4 + $0x1], 0 }
   0x8   :  { %24 = vsyncpa [#allocation9], 0 }
   0x9   :  { %26 = vsyncpa [#allocation9 + $0x1], 0  ;;  %s2832_s30 = smov 0   ;;  %s2834_s10 = smov 0  }
   0xa   :  { %s2836_s11 = smov 0   ;;  %s2838_s12 = smov 0  }
   0xb LB: > { %3370 = sst [smem:[#allocation14_spill]] %s2759_s11  ;;  %s2853_s13 = sadd.s32 4294967295, %s2763_s12   ;;  %s2763_s12 = sphi %s2838_s12, %s3389_s12   ;;  %s2759_s11 = sphi %s2836_s11, %s3391_s11   ;;  %s2755_s10 = sphi %s2834_s10, %s3393_s10   ;;  %s2751_s30 = sphi %s2832_s30, %s3392_s30  }
   0xc   : > { %s2135_s14 = sadd.s32 4294967294, %s2763_s12   ;;  %s2857_s15 = sadd.s32 1, %s2763_s12  }
   0xd   : > { %3371 = sst [smem:[#allocation15_spill]] %s2857_s15  ;;  %s39_s16 = sadd.s32 1, %s2759_s11 }
   0xe   : > { %s36_s17 = ssub.s32 %s2763_s12, %s2857_s15  ;;  %p46_p0 = scmp.ne.s32.totalorder %s2759_s11, %s2755_s10 }
   0xf   : > { %p37_p1 = scmp.eq.s32.totalorder %s36_s17, 0  ;;  %p47_p2 = scmp.eq.s32.totalorder %s2763_s12, 0 }
  0x10   : > { %p52_p3 = scmp.ne.s32.totalorder %s2755_s10, %s2751_s30  ;;  %p53_p4 = scmp.eq.s32.totalorder %s2853_s13, 0 }
  0x11   : > { %s2869_s18 = scalar_select %p37_p1, %s2759_s11, %s39_s16  }
  0x12   : > { %p2871_p5 = por %p47_p2, %p46_p0  ;;  %p2875_p6 = por %p53_p4, %p52_p3 }
  0x13   : > { %3372 = sst [smem:[#allocation16_spill]] %s2869_s18  ;;  %p228_p7 = scmp.eq.s32.totalorder %s2853_s13, 7 }
  0x14   : > { %s3374_s20 = scalar_select %p2875_p6, 1, 0 }
  0x15   : > { %p234_p8 = scmp.eq.s32.totalorder %s2135_s14, 7  ;;  %p2491_p9 = scmp.lt.s32.totalorder %s2763_s12, 8 }
  0x16   : > { %p2881_p10 = por %p228_p7, %p46_p0  ;;  %s2890_s23 = sand.u32 1, %s2759_s11  }
  0x17   : > { %p2885_p11 = por %p234_p8, %p52_p3  ;;  %s3362_s24 = sshll.u32 %s2763_s12, 8 }
  0x18   : > { %s3375_s21 = scalar_select %p2881_p10, 1, 0 }
  0x19   : > { %s3376_s22 = scalar_select %p2885_p11, 1, 0 }
  0x1a   : > { %s3361_s25 = sshll.u32 %s2890_s23, 4  ;;  %s3377_s0 = sld [smem:[#allocation17_spill]] }
  0x1b   : > { %s302_s29 = scalar_lea.vmem [#allocation2], %s3361_s25  ;;  %p2905_p12 = pnand %p2491_p9, %p2871_p5 }
  0x1c   : > { %s309_s14 = sshll.u32 %s302_s29, 4  ;;  %s2909_s14 = int_to_ptr.vmem [resolvable:$true] %s309_s14 }
  0x1d   : > { %p2603_p0 = pneg %p2905_p12 }
  0x20   : > { %s2899_s28 = scalar_lea.hbm %s3377_s0, %s3362_s24  ;;  %s2606_s19 = scalar_lea.hbm %s3377_s0, 2048 }
  0x21   : > { %s2601_s26 = scalar_lea.hbm %s2899_s28, 256  ;;  %p2607_p3 = scmp.lt.u32.totalorder %s2899_s28, %s3377_s0 }
  0x22   : > { %p2602_p13 = scmp.ne.s32.totalorder %s2899_s28, %s2601_s26  ;;  %p2608_p4 = scmp.lt.u32.totalorder %s2606_s19, %s2601_s26 }
  0x23   : > { %p2610_p7 = scmp.lt.u32.totalorder %s2601_s26, %s2899_s28 }
  0x24   : > { %p2604_p1 = pnand %p2603_p0, %p2602_p13  ;;  %p2609_p5 = por %p2608_p4, %p2607_p3 }
  0x26   : > { %p2605_p2 = pneg %p2604_p1  ;;  %p2611_p8 = por %p2610_p7, %p2609_p5 }
  0x28   : > { %p2612_p9 = pnand %p2611_p8, %p2605_p2 }
  0x2a   : > { %2615 = shalt.err (!%p2612_p9)
}
  0x2b   : > { %s2616_s17 = scalar_lea.vmem %s2909_s14, 256  ;;  %s2765_s27 = smov [#allocation2]  }
  0x2c   : > { %p2617_p13 = scmp.ne.s32.totalorder %s2909_s14, %s2616_s17  ;;  %s2621_s29 = sshll.u32 %s2765_s27, 4  ;;  %s2622_s29 = int_to_ptr.vmem [resolvable:$false] %s2621_s29 }
  0x2d   : > { %s2623_s24 = scalar_lea.vmem %s2622_s29, 512  ;;  %p2624_p10 = scmp.lt.s32.totalorder %s2909_s14, %s2622_s29 }
  0x2e   : > { %p2619_p1 = pnand %p2617_p13, %p2603_p0  ;;  %p2625_p3 = scmp.lt.s32.totalorder %s2623_s24, %s2616_s17 }
  0x30   : > { %p2620_p11 = pneg %p2619_p1  ;;  %p2626_p4 = por %p2625_p3, %p2624_p10 }
  0x32   : > { %p2627_p5 = pnand %p2626_p4, %p2620_p11 }
  0x34   : > { %2630 = shalt.err (!%p2627_p5)
}
  0x35   : > { %s3367_s25 = smov 128   ;;  %s2767_s26 = smov 8  }
  0x36   : > { %s3379_s17 = scalar_lea.sflag [#allocation3], %s2890_s23  ;;  %p2144_p10 = scmp.ge.s32.totalorder %s2763_s12, 1 }
  0x37   : > { %2480 = dma.hbm_to_vmem [thread:$0]  (!%p2905_p12), %s2899_s28, 256, %s2909_s14, %s3379_s17, %s3367_s25, %s3367_s25, %s2767_s26  }
  0x38   : > { %p338_p11 = scmp.lt.s32.totalorder %s2763_s12, 9  ;;  %s3381_s27 = sshll.u32 %s2763_s12, 8 }
  0x39   : > { %s2953_s0 = scalar_lea.hbm %s3352_s1, %s3381_s27  ;;  %s3382_s18 = sshll.u32 %s2890_s23, 4 }
  0x3a   : > { %p2944_p2 = pnand %p2144_p10, %p338_p11  ;;  %s323_s11 = scalar_lea.vmem [#allocation5], %s3382_s18 }
  0x3b   : > { %s330_s15 = sshll.u32 %s323_s11, 4  ;;  %s320_s28 = scalar_lea.sflag [#allocation6], %s2890_s23  ;;  %s2957_s15 = int_to_ptr.vmem [resolvable:$true] %s330_s15 }
  0x3c   : > { %s2631_s14 = scalar_lea.hbm %s2953_s0, 256  ;;  %s2636_s27 = scalar_lea.hbm %s3352_s1, 2048 }
  0x3d   : > { %p2632_p7 = scmp.ne.s32.totalorder %s2953_s0, %s2631_s14  ;;  %p2637_p13 = scmp.lt.u32.totalorder %s2953_s0, %s3352_s1 }
  0x3e   : > { %p2638_p1 = scmp.lt.u32.totalorder %s2636_s27, %s2631_s14  ;;  %p2640_p4 = scmp.lt.u32.totalorder %s2631_s14, %s2953_s0 }
  0x3f   : > { %p2634_p8 = pnand %p2632_p7, %p2603_p0 }
  0x40   : > { %p2639_p3 = por %p2638_p1, %p2637_p13 }
  0x41   : > { %p2635_p9 = pneg %p2634_p8 }
  0x42   : > { %p2641_p5 = por %p2640_p4, %p2639_p3 }
  0x44   : > { %p2642_p10 = pnand %p2641_p5, %p2635_p9 }
  0x46   : > { %2645 = shalt.err (!%p2642_p10)
}
  0x47   : > { %s2646_s11 = scalar_lea.vmem %s2957_s15, 256  ;;  %s2768_s18 = smov [#allocation5]  }
  0x48   : > { %p2647_p11 = scmp.ne.s32.totalorder %s2957_s15, %s2646_s11  ;;  %s2651_s17 = sshll.u32 %s2768_s18, 4  ;;  %s2652_s17 = int_to_ptr.vmem [resolvable:$false] %s2651_s17 }
  0x49   : > { %s2653_s25 = scalar_lea.vmem %s2652_s17, 512  ;;  %p2654_p6 = scmp.lt.s32.totalorder %s2957_s15, %s2652_s17 }
  0x4a   : > { %p2649_p7 = pnand %p2647_p11, %p2603_p0  ;;  %p2655_p13 = scmp.lt.s32.totalorder %s2653_s25, %s2646_s11 }
  0x4c   : > { %p2650_p8 = pneg %p2649_p7  ;;  %p2656_p1 = por %p2655_p13, %p2654_p6 }
  0x4e   : > { %p2657_p3 = pnand %p2656_p1, %p2650_p8 }
  0x50   : > { %2660 = shalt.err (!%p2657_p3)
}
  0x51   : > { %s3383_s14 = smov 128   ;;  %342 = sbr.rel (%p2944_p2) target bundleno = 4256 (0x10a0), region = 52 }
  0x52   : > { %2483 = dma.hbm_to_vmem [thread:$0]  (!%p2905_p12), %s2953_s0, 256, %s2957_s15, %s320_s28, %s3383_s14, %s3383_s14, %s2767_s26  }
  0x53   : > { %s2991_s29 = sand.u32 (!%p2944_p2), 1, %s2755_s10   ;;  %p3384_p6 = scmp.ne.s32.totalorder (!%p2944_p2), %s3374_s20, 0 }
  0x54   : > { %s2994_s27 = sshll.u32 (!%p2944_p2), %s2991_s29, 4  ;;  %s345_s16 = scalar_lea.sflag (!%p2944_p2), [#allocation3], %s2991_s29 }
  0x55   : > { %s348_s24 = scalar_lea.vmem (!%p2944_p2), [#allocation2], %s2994_s27 }
  0x58   : > { %2734 = dma.done.wait (%p3384_p6), %s345_s16, 256  }
  0x59   : > { %2736 = vsyncadd (%p3384_p6), %s345_s16, 4294967040  ;;  %s354_s0 = scalar_lea.sflag [#allocation6], %s2991_s29  ;;  %s357_s15 = scalar_lea.vmem [#allocation5], %s2994_s27 }
  0x5a   : > { %2738 = dma.done.wait (%p3384_p6), %s354_s0, 256  }
  0x5b   : > { %2740 = vsyncadd (%p3384_p6), %s354_s0, 4294967040  ;;  %vm410_vm0 = vcmask 130048   ;;  %v408_v0 = vld [vmem:[%s3353_s2] sm:$0xff]  ;;  %v409_v1 = vld [vmem:[%s3353_s2 + $0x8] sm:$0xff]  ;;  %s2769_s17 = smov 112   ;;  %v2770_v6 = vmov 0.0|0.0   ;;  %v493_v8 = vlaneseq }
  0x5c   : > { %v402_v2 = vld [vmem:[%s348_s24] sm:$0xff]  ;;  %v2391_v3 = vpack.c.bf16 %v409_v1, %v408_v0  ;;  %v403_v5 = vld [vmem:[%s348_s24 + $0x8] sm:$0xff]  ;;  %vm2771_vm1 = vmmov 0   ;;  %v2772_v7 = vmov 0.0   ;;  %vm3033_vm2 = vmpackc.low %vm410_vm0, %vm410_vm0  ;;  %s2773_s14 = smov 16   ;;  %s2774_s0 = smov 96  }
  0x5d   : > { %2274 = vmatprep.mubr.msk.f32.mxu1 %vm410_vm0, %v402_v2  ;;  %v492_v4 = vld [vmem:[%s3354_s3] sm:$0x1]  ;;  %v494_v9 = vshrl.u32 %v493_v8, 7  ;;  %v3058_v30 = vld [vmem:[%s357_s15 + $0x8] sm:$0xff]  ;;  %v715_v39 = vld [vmem:[%s3354_s3 + $0x1] sm:$0x1] }
  0x5e   : > { %506 = vrot.lane.b32.xlu0 %v492_v4, %s2769_s17  ;;  %2392 = vmatprep.subr.bf16.mxu1 %v2391_v3  ;;  %v3053_v25 = vld [vmem:[%s357_s15] sm:$0xff]  ;;  %vm407_vm6 = vcmp.gt.f32.partialorder %v3058_v30, 0.0  ;;  %s2775_s15 = smov 32   ;;  %s2776_s19 = smov 48  }
  0x5f   : > { %2394 = vmatpush3.bf16.msra.mxu1 %v2391_v3  ;;  %v3023_v10 = vsub.s32 0, %v494_v9  ;;  %vm406_vm3 = vcmp.gt.f32.partialorder %v3053_v25, 0.0  ;;  %s2777_s28 = smov 80   ;;  %s2204_s25 = sshll.u32 %s2853_s13, 8 }
  0x60   : > { %2395 = vmatprep.subr.bf16.mxu1 %v2770_v6  ;;  %s3266_s24 = scalar_lea.hbm %s3360_s9, %s2204_s25  ;;  %p3387_p0 = scmp.ne.s32.totalorder %s3375_s21, 0 }
  0x61   : > { %v496_v11 = vrot.slane %v492_v4, %v3023_v10  ;;  %v719_v50 = vrot.slane %v715_v39, %v3023_v10  ;;  %s2778_s23 = smov [#allocation8]  }
  0x62   : > { %2275 = vmatmul.mubr.msk.f32.vlgmr.msra.gmra.mrb[0].mxu1 %vm410_vm0, %v403_v5  ;;  %s2665_s26 = sshll.u32 %s2778_s23, 4  ;;  %s2666_s26 = int_to_ptr.vmem [resolvable:$false] %s2665_s26 }
  0x63   : > { %2281 = vmatprep.mubr.msk.f32.mxu1 %vm2771_vm1, %v2772_v7 }
  0xd0   : > { %v507_v21 = vpop.permute.xlu0 %506 }
 0x135   : > { %v3026_v12 = vpop.f32.mrb[0].mxu1 }
 0x136   : > { %v3028_v13 = vpop.f32.mrb[1].mxu1  ;;  %v498_v14 = vmul.f32 %v3026_v12, %v496_v11 }
 0x137   : > { %v2396_v16 = vpack.c.bf16 %v3026_v12, %v3028_v13  ;;  %v497_v17 = vmul.f32 %v496_v11, %v3028_v13  ;;  %v3042_v18 = vpack.i.bf16 %v3026_v12, %v3028_v13 }
 0x138   : > { %v502_v19 = vsel %vm410_vm0, %v498_v14, 0.0 }
 0x139   : > { %503 = vadd.xlane.f32.xlu1 %v502_v19  ;;  %2398 = vmatpush3.bf16.xpose.msk.msra.mxu1 %vm3033_vm2, %v2396_v16  ;;  %v499_v20 = vsel %vm410_vm0, %v497_v17, 0.0 }
 0x13a   : > { %2400 = vmatprep.subr.bf16.mxu0 %v2396_v16  ;;  %500 = vadd.xlane.f32.xlu0 %v499_v20 }
 0x13b   : > { %2402 = vmatpush3.bf16.msra.mxu0 %v2396_v16 }
 0x13c   : > { %2403 = vmatprep.subr.bf16.mxu0 %v2770_v6 }
 0x140   : > { %2282 = vmatmul.mubr.msk.f32.vlgmr.msra.gmra.mrb[2].mxu1 %vm410_vm0, %v507_v21 }
 0x150   : > { %741 = vrot.lane.b32.xlu0 %v715_v39, %s2769_s17 }
 0x1c6   : > { %v504_v26 = vpop.xlane.xlu1 %503 }
 0x1c7   : > { %v501_v27 = vpop.xlane.xlu0 %500 }
 0x1cb   : > { %v742_v0 = vpop.permute.xlu0 %741 }
 0x213   : > { %v582_v22 = vpop.f32.mrb[2].mxu1 }
 0x214   : > { %v589_v23 = vrot.slane %v582_v22, %v3023_v10  ;;  %v2283_v24 = vpop.f32.mrb[3].mxu1 }
 0x216   : > { %v590_v28 = vadd.f32 %v589_v23, %v501_v27  ;;  %v591_v29 = vadd.f32 %v589_v23, %v504_v26 }
 0x218   : > { %vm592_vm4 = vcmp.gt.f32.partialorder %v590_v28, 0.0  ;;  %v594_v31 = vmul.f32 0.2, %v590_v28  ;;  %vm593_vm5 = vcmp.gt.f32.partialorder %v591_v29, 0.0  ;;  %v595_v32 = vmul.f32 0.2, %v591_v29 }
 0x21a   : > { %v596_v33 = vsel %vm592_vm4, %v590_v28, %v594_v31  ;;  %v597_v34 = vsel %vm593_vm5, %v591_v29, %v595_v32 }
 0x21b   : > { %v598_v35 = vsel %vm406_vm3, %v596_v33, -9e+15  ;;  %v599_v37 = vsel %vm407_vm6, %v597_v34, -9e+15 }
 0x21c   : > { %v600_v36 = vsel %vm410_vm0, %v598_v35, -inf  ;;  %v603_v38 = vsel %vm410_vm0, %v599_v37, -inf }
 0x21d   : > { %601 = vmax.xlane.f32.xlu1 %v600_v36 }
 0x221   : > { %604 = vmax.xlane.f32.xlu1 %v603_v38 }
 0x2aa   : > { %v602_v40 = vpop.xlane.xlu1 %601 }
 0x2ab   : > { %v606_v41 = vsub.f32 %v598_v35, %v602_v40 }
 0x2ad   : > { %v608_v42 = vmul.f32 1.442695, %v606_v41  ;;  %v954_v41 = vld [vmem:[%s3354_s3 + $0x2] sm:$0x1] }
 0x2ae   : > { %v605_v43 = vpop.xlane.xlu1 %604 }
 0x2af   : > { %2553 = vpow2.f32 %v608_v42  ;;  %v607_v44 = vsub.f32 %v599_v37, %v605_v43  ;;  %v958_v42 = vrot.slane %v954_v41, %v3023_v10 }
 0x2b1   : > { %v610_v45 = vmul.f32 1.442695, %v607_v44 }
 0x2b3   : > { %2555 = vpow2.f32 %v610_v45 }
 0x2b9   : > { %v2554_v46 = vpop.eup %2553 }
 0x2ba   : > { %v612_v47 = vsel %vm410_vm0, %v2554_v46, 0.0 }
 0x2bb   : > { %613 = vadd.xlane.f32.xlu1 %v612_v47 }
 0x2bd   : > { %v2556_v48 = vpop.eup %2555 }
 0x2be   : > { %v615_v49 = vsel %vm410_vm0, %v2556_v48, 0.0 }
 0x2bf   : > { %616 = vadd.xlane.f32.xlu1 %v615_v49 }
 0x2d0   : > { %2539 = vrot.lane.b32.xlu1 %v3042_v18, %s2769_s17 }
 0x2d4   : > { %721 = vrot.lane.b32.xlu1 %v719_v50, %s2773_s14 }
 0x348   : > { %v614_v51 = vpop.xlane.xlu1 %613 }
 0x349   : > { %2557 = vrcp.f32 %v614_v51 }
 0x34c   : > { %v617_v52 = vpop.xlane.xlu1 %616 }
 0x34d   : > { %2559 = vrcp.f32 %v617_v52 }
 0x350   : > { %v2540_v53 = vpop.permute.xlu1 %2539 }
 0x351   : > { %v2542_v54 = vunpack.i.h.bf16 %v2540_v53  ;;  %v2541_v55 = vunpack.i.l.bf16 %v2540_v53 }
 0x353   : > { %v2558_v56 = vpop.eup %2557  ;;  %v2404_v57 = vpack.c.bf16 %v2542_v54, %v2541_v55 }
 0x354   : > { %v722_v58 = vpop.permute.xlu1 %721  ;;  %v620_v59 = vmul.f32 %v2558_v56, %v2554_v46 }
 0x355   : > { %v724_v60 = vmul.f32 %v722_v58, %v3028_v13  ;;  %2408 = vmatprep.subr.bf16.mxu1 %v2404_v57  ;;  %v725_v63 = vmul.f32 %v3026_v12, %v722_v58 }
 0x356   : > { %2288 = vmatprep.mubr.msk.f32.mxu0 %vm410_vm0, %v620_v59  ;;  %2410 = vmatpush3.bf16.msra.mxu1 %v2404_v57 }
 0x357   : > { %v2560_v61 = vpop.eup %2559  ;;  %728 = vrot.lane.b32.xlu1 %v724_v60, %s2769_s17  ;;  %2411 = vmatprep.subr.bf16.mxu1 %v2770_v6 }
 0x358   : > { %v621_v62 = vmul.f32 %v2560_v61, %v2556_v48 }
 0x35a   : > { %2289 = vmatmul.mubr.msk.f32.vlgmr.msra.gmra.mrb[0].mxu0 %vm410_vm0, %v621_v62 }
 0x35b   : > { %2406 = vmatpush3.bf16.xpose.msk.msra.mxu0 %vm3033_vm2, %v2404_v57  ;;  %730 = vrot.lane.b32.xlu1 %v725_v63, %s2769_s17 }
 0x35c   : > { %2295 = vmatprep.mubr.msk.f32.mxu0 %vm2771_vm1, %v2772_v7 }
 0x362   : > { %2296 = vmatmul.mubr.msk.f32.vlgmr.msra.gmra.mrb[2].mxu0 %vm410_vm0, %v742_v0 }
 0x3c9   : > { %v729_v1 = vpop.permute.xlu1 %728 }
 0x3ca   : > { %v734_v2 = vsel %vm410_vm0, %v729_v1, 0.0 }
 0x3cb   : > { %735 = vadd.xlane.f32.xlu1 %v734_v2 }
 0x3cd   : > { %v731_v3 = vpop.permute.xlu1 %730 }
 0x3ce   : > { %v737_v4 = vsel %vm410_vm0, %v731_v3, 0.0 }
 0x3cf   : > { %738 = vadd.xlane.f32.xlu0 %v737_v4 }
 0x42d   : > { %v3091_v5 = vpop.f32.mrb[0].mxu0 }
 0x42e   : > { %v3093_v8 = vpop.f32.mrb[1].mxu0 }
 0x42f   : > { %vm703_vm5 = vcmp.gt.f32.partialorder %v3093_v8, 0.0 }
 0x435   : > { %v819_v9 = vpop.f32.mrb[2].mxu0 }
 0x436   : > { %v2297_v11 = vpop.f32.mrb[3].mxu0  ;;  %v826_v14 = vrot.slane %v819_v9, %v3023_v10 }
 0x458   : > { %v736_v16 = vpop.xlane.xlu1 %735 }
 0x459   : > { %v827_v17 = vadd.f32 %v826_v14, %v736_v16 }
 0x45b   : > { %v831_v19 = vmul.f32 0.2, %v827_v17  ;;  %vm829_vm7 = vcmp.gt.f32.partialorder %v827_v17, 0.0 }
 0x45c   : > { %v739_v20 = vpop.xlane.xlu0 %738 }
 0x45d   : > { %v828_v21 = vadd.f32 %v826_v14, %v739_v20  ;;  %v833_v22 = vsel %vm829_vm7, %v827_v17, %v831_v19  ;;  %vm704_vm7 = vcmp.gt.f32.partialorder %v3091_v5, 0.0 }
 0x45e   : > { %v835_v23 = vsel %vm406_vm3, %v833_v22, -9e+15 }
 0x45f   : > { %v832_v24 = vmul.f32 0.2, %v828_v21  ;;  %v837_v26 = vsel %vm410_vm0, %v835_v23, -inf  ;;  %vm830_vm8 = vcmp.gt.f32.partialorder %v828_v21, 0.0 }
 0x460   : > { %838 = vmax.xlane.f32.xlu1 %v837_v26 }
 0x461   : > { %v834_v27 = vsel %vm830_vm8, %v828_v21, %v832_v24  ;;  %vm1461_vm8 = vcmask 392192  }
 0x462   : > { %v836_v28 = vsel %vm407_vm6, %v834_v27, -9e+15 }
 0x463   : > { %v840_v29 = vsel %vm410_vm0, %v836_v28, -inf }
 0x464   : > { %841 = vmax.xlane.f32.xlu0 %v840_v29 }
 0x4ed   : > { %v839_v31 = vpop.xlane.xlu1 %838 }
 0x4ee   : > { %v843_v32 = vsub.f32 %v835_v23, %v839_v31 }
 0x4f0   : > { %v845_v33 = vmul.f32 1.442695, %v843_v32 }
 0x4f1   : > { %v842_v34 = vpop.xlane.xlu0 %841 }
 0x4f2   : > { %2561 = vpow2.f32 %v845_v33  ;;  %v844_v35 = vsub.f32 %v836_v28, %v842_v34  ;;  %v1193_v34 = vld [vmem:[%s3354_s3 + $0x3] sm:$0x1] }
 0x4f4   : > { %v847_v36 = vmul.f32 1.442695, %v844_v35  ;;  %v1197_v35 = vrot.slane %v1193_v34, %v3023_v10 }
 0x4f6   : > { %2563 = vpow2.f32 %v847_v36 }
 0x4fc   : > { %v2562_v37 = vpop.eup %2561 }
 0x4fd   : > { %v849_v38 = vsel %vm410_vm0, %v2562_v37, 0.0 }
 0x4fe   : > { %850 = vadd.xlane.f32.xlu1 %v849_v38 }
 0x500   : > { %v2564_v39 = vpop.eup %2563 }
 0x501   : > { %v852_v40 = vsel %vm410_vm0, %v2564_v39, 0.0 }
 0x502   : > { %853 = vadd.xlane.f32.xlu0 %v852_v40 }
 0x50f   : > { %2544 = vrot.lane.b32.xlu1 %v3042_v18, %s2774_s0 }
 0x513   : > { %960 = vrot.lane.b32.xlu1 %v958_v42, %s2775_s15 }
 0x518   : > { %980 = vrot.lane.b32.xlu0 %v954_v41, %s2769_s17 }
 0x58b   : > { %v851_v43 = vpop.xlane.xlu1 %850 }
 0x58c   : > { %2565 = vrcp.f32 %v851_v43 }
 0x58f   : > { %v2545_v44 = vpop.permute.xlu1 %2544  ;;  %v854_v45 = vpop.xlane.xlu0 %853 }
 0x590   : > { %v2547_v46 = vunpack.i.h.bf16 %v2545_v44  ;;  %v2546_v47 = vunpack.i.l.bf16 %v2545_v44  ;;  %2567 = vrcp.f32 %v854_v45 }
 0x592   : > { %v2412_v48 = vpack.c.bf16 %v2547_v46, %v2546_v47 }
 0x593   : > { %v961_v49 = vpop.permute.xlu1 %960  ;;  %v981_v56 = vpop.permute.xlu0 %980 }
 0x594   : > { %v963_v50 = vmul.f32 %v961_v49, %v3028_v13  ;;  %v964_v51 = vmul.f32 %v3026_v12, %v961_v49  ;;  %2416 = vmatprep.subr.bf16.mxu0 %v2412_v48 }
 0x595   : > { %2418 = vmatpush3.bf16.msra.mxu0 %v2412_v48 }
 0x596   : > { %v2566_v52 = vpop.eup %2565  ;;  %967 = vrot.lane.b32.xlu1 %v963_v50, %s2774_s0  ;;  %969 = vrot.lane.b32.xlu0 %v964_v51, %s2774_s0  ;;  %s1978_s0 = scalar_lea.sflag [#allocation9], %s2991_s29 }
 0x597   : > { %v857_v53 = vmul.f32 %v2566_v52, %v2562_v37  ;;  %2419 = vmatprep.subr.bf16.mxu0 %v2770_v6 }
 0x599   : > { %2302 = vmatprep.mubr.msk.f32.mxu1 %vm410_vm0, %v857_v53 }
 0x59a   : > { %v2568_v54 = vpop.eup %2567 }
 0x59b   : > { %v858_v55 = vmul.f32 %v2568_v54, %v2564_v39 }
 0x59d   : > { %2303 = vmatmul.mubr.msk.f32.vlgmr.msra.gmra.mrb[4].mxu1 %vm410_vm0, %v858_v55 }
 0x59e   : > { %2414 = vmatpush3.bf16.xpose.msk.msra.mxu1 %vm3033_vm2, %v2412_v48  ;;  %2309 = vmatprep.mubr.msk.f32.mxu1 %vm2771_vm1, %v2772_v7 }
 0x5a5   : > { %2310 = vmatmul.mubr.msk.f32.vlgmr.msra.gmra.mrb[6].mxu1 %vm410_vm0, %v981_v56 }
 0x608   : > { %v968_v57 = vpop.permute.xlu1 %967  ;;  %v970_v58 = vpop.permute.xlu0 %969 }
 0x609   : > { %v973_v59 = vsel %vm410_vm0, %v968_v57, 0.0  ;;  %v976_v6 = vsel %vm410_vm0, %v970_v58, 0.0 }
 0x60a   : > { %974 = vadd.xlane.f32.xlu1 %v973_v59  ;;  %977 = vadd.xlane.f32.xlu0 %v976_v6 }
 0x670   : > { %v3123_v60 = vpop.f32.mrb[4].mxu1 }
 0x671   : > { %v3125_v61 = vpop.f32.mrb[5].mxu1 }
 0x672   : > { %vm942_vm13 = vcmp.gt.f32.partialorder %v3125_v61, 0.0 }
 0x678   : > { %v1058_v62 = vpop.f32.mrb[6].mxu1 }
 0x679   : > { %v2311_v63 = vpop.f32.mrb[7].mxu1  ;;  %v1065_v0 = vrot.slane %v1058_v62, %v3023_v10 }
 0x697   : > { %v975_v1 = vpop.xlane.xlu1 %974  ;;  %v978_v2 = vpop.xlane.xlu0 %977 }
 0x698   : > { %v1066_v3 = vadd.f32 %v1065_v0, %v975_v1  ;;  %v1067_v4 = vadd.f32 %v1065_v0, %v978_v2 }
 0x69a   : > { %v1070_v9 = vmul.f32 0.2, %v1066_v3  ;;  %v1071_v11 = vmul.f32 0.2, %v1067_v4  ;;  %vm1068_vm9 = vcmp.gt.f32.partialorder %v1066_v3, 0.0  ;;  %vm1069_vm10 = vcmp.gt.f32.partialorder %v1067_v4, 0.0 }
 0x69c   : > { %v1072_v14 = vsel %vm1068_vm9, %v1066_v3, %v1070_v9  ;;  %v1073_v16 = vsel %vm1069_vm10, %v1067_v4, %v1071_v11  ;;  %vm1479_vm9 = vcmask 523264  }
 0x69d   : > { %v1074_v17 = vsel %vm406_vm3, %v1072_v14, -9e+15  ;;  %v1075_v19 = vsel %vm407_vm6, %v1073_v16, -9e+15 }
 0x69e   : > { %v1076_v20 = vsel %vm410_vm0, %v1074_v17, -inf  ;;  %v1079_v21 = vsel %vm410_vm0, %v1075_v19, -inf }
 0x69f   : > { %1077 = vmax.xlane.f32.xlu0 %v1076_v20  ;;  %1080 = vmax.xlane.f32.xlu1 %v1079_v21 }
 0x72c   : > { %v1081_v22 = vpop.xlane.xlu1 %1080  ;;  %v1078_v23 = vpop.xlane.xlu0 %1077 }
 0x72d   : > { %v1083_v24 = vsub.f32 %v1075_v19, %v1081_v22  ;;  %v1082_v26 = vsub.f32 %v1074_v17, %v1078_v23  ;;  %v944_v17 = vmin.f32 %v3125_v61, 0.0 }
 0x72f   : > { %v1086_v27 = vmul.f32 1.442695, %v1083_v24  ;;  %v1084_v28 = vmul.f32 1.442695, %v1082_v26  ;;  %v946_v19 = vmul.f32 1.442695, %v944_v17 }
 0x730   : > { %v945_v26 = vmin.f32 %v3123_v60, 0.0 }
 0x731   : > { %2569 = vpow2.f32 %v1086_v27 }
 0x732   : > { %2571 = vpow2.f32 %v1084_v28 }
 0x73b   : > { %v2570_v29 = vpop.eup %2569 }
 0x73c   : > { %v2572_v31 = vpop.eup %2571  ;;  %v1091_v32 = vsel %vm410_vm0, %v2570_v29, 0.0 }
 0x73d   : > { %1092 = vadd.xlane.f32.xlu1 %v1091_v32  ;;  %v1088_v33 = vsel %vm410_vm0, %v2572_v31, 0.0 }
 0x73e   : > { %1089 = vadd.xlane.f32.xlu0 %v1088_v33 }
 0x74e   : > { %1219 = vrot.lane.b32.xlu1 %v1193_v34, %s2769_s17 }
 0x752   : > { %1199 = vrot.lane.b32.xlu1 %v1197_v35, %s2776_s19 }
 0x754   : > { %2549 = vrot.lane.b32.xlu0 %v3042_v18, %s2777_s28 }
 0x7ca   : > { %v1093_v36 = vpop.xlane.xlu1 %1092 }
 0x7cb   : > { %2573 = vrcp.f32 %v1093_v36  ;;  %v1090_v37 = vpop.xlane.xlu0 %1089 }
 0x7cc   : > { %2575 = vrcp.f32 %v1090_v37 }
 0x7ce   : > { %v1220_v38 = vpop.permute.xlu1 %1219 }
 0x7cf   : > { %v2550_v39 = vpop.permute.xlu0 %2549 }
 0x7d0   : > { %v2552_v40 = vunpack.i.h.bf16 %v2550_v39  ;;  %v2551_v41 = vunpack.i.l.bf16 %v2550_v39 }
 0x7d2   : > { %v2420_v42 = vpack.c.bf16 %v2552_v40, %v2551_v41  ;;  %v1200_v43 = vpop.permute.xlu1 %1199 }
 0x7d3   : > { %v1202_v44 = vmul.f32 %v1200_v43, %v3028_v13  ;;  %v1203_v45 = vmul.f32 %v3026_v12, %v1200_v43 }
 0x7d4   : > { %2424 = vmatprep.subr.bf16.mxu1 %v2420_v42 }
 0x7d5   : > { %v2574_v46 = vpop.eup %2573  ;;  %2426 = vmatpush3.bf16.msra.mxu1 %v2420_v42  ;;  %1208 = vrot.lane.b32.xlu1 %v1203_v45, %s2777_s28 }
 0x7d6   : > { %v2576_v47 = vpop.eup %2575  ;;  %v1097_v18 = vmul.f32 %v2574_v46, %v2570_v29  ;;  %1206 = vrot.lane.b32.xlu0 %v1202_v44, %s2777_s28  ;;  %s2667_s28 = scalar_lea.vmem %s2666_s26, 512 }
 0x7d7   : > { %v1096_v48 = vmul.f32 %v2576_v47, %v2572_v31  ;;  %v948_v31 = vmul.f32 1.442695, %v945_v26 }
 0x7d9   : > { %2316 = vmatprep.mubr.msk.f32.mxu0 %vm410_vm0, %v1096_v48  ;;  %v1464_v48 = vld [vmem:[%s3355_s4] sm:$0xff] }
 0x7da   : > { %2317 = vmatmul.mubr.msk.f32.vlgmr.msra.gmra.mrb[4].mxu0 %vm410_vm0, %v1097_v18 }
 0x7db   : > { %2422 = vmatpush3.bf16.xpose.msk.msra.mxu0 %vm3033_vm2, %v2420_v42  ;;  %2323 = vmatprep.mubr.msk.f32.mxu0 %vm2771_vm1, %v2772_v7  ;;  %vm943_vm1 = vcmp.gt.f32.partialorder %v3123_v60, 0.0 }
 0x7e2   : > { %2324 = vmatmul.mubr.msk.f32.vlgmr.msra.gmra.mrb[6].mxu0 %vm410_vm0, %v1220_v38 }
 0x847   : > { %v1209_v12 = vpop.permute.xlu1 %1208 }
 0x848   : > { %v1207_v13 = vpop.permute.xlu0 %1206  ;;  %v1215_v49 = vsel %vm410_vm0, %v1209_v12, 0.0  ;;  %v1466_v12 = vld [vmem:[%s3355_s4 + $0x10] sm:$0xff] }
 0x849   : > { %1216 = vadd.xlane.f32.xlu1 %v1215_v49  ;;  %v1212_v50 = vsel %vm410_vm0, %v1207_v13, 0.0  ;;  %v1467_v49 = vld [vmem:[%s3355_s4 + $0x18] sm:$0xff] }
 0x84a   : > { %1213 = vadd.xlane.f32.xlu0 %v1212_v50  ;;  %v2431_v50 = vpack.c.bf16 %v1467_v49, %v1466_v12 }
 0x8ad   : > { %v3154_v51 = vpop.f32.mrb[4].mxu0 }
 0x8ae   : > { %v1172_v52 = vpop.f32.mrb[5].mxu0  ;;  %v1184_v22 = vmin.f32 %v3154_v51, 0.0  ;;  %vm1182_vm15 = vcmp.gt.f32.partialorder %v3154_v51, 0.0 }
 0x8af   : > { %v1183_v20 = vmin.f32 %v1172_v52, 0.0  ;;  %vm1181_vm14 = vcmp.gt.f32.partialorder %v1172_v52, 0.0 }
 0x8b0   : > { %v1187_v28 = vmul.f32 1.442695, %v1184_v22 }
 0x8b1   : > { %v1185_v23 = vmul.f32 1.442695, %v1183_v20 }
 0x8b5   : > { %v1297_v53 = vpop.f32.mrb[6].mxu0 }
 0x8b6   : > { %v2325_v54 = vpop.f32.mrb[7].mxu0  ;;  %v1304_v55 = vrot.slane %v1297_v53, %v3023_v10 }
 0x8b7   : > { %v1470_v54 = vld [vmem:[%s3355_s4 + $0x30] sm:$0xff] }
 0x8d6   : > { %v1217_v56 = vpop.xlane.xlu1 %1216 }
 0x8d7   : > { %v1306_v57 = vadd.f32 %v1304_v55, %v1217_v56  ;;  %v1214_v7 = vpop.xlane.xlu0 %1213 }
 0x8d8   : > { %v1305_v58 = vadd.f32 %v1304_v55, %v1214_v7  ;;  %v1471_v55 = vld [vmem:[%s3355_s4 + $0x38] sm:$0xff] }
 0x8d9   : > { %v1310_v59 = vmul.f32 0.2, %v1306_v57  ;;  %vm1308_vm11 = vcmp.gt.f32.partialorder %v1306_v57, 0.0  ;;  %v2439_v56 = vpack.c.bf16 %v1471_v55, %v1470_v54 }
 0x8da   : > { %v1309_v6 = vmul.f32 0.2, %v1305_v58  ;;  %vm1307_vm12 = vcmp.gt.f32.partialorder %v1305_v58, 0.0 }
 0x8db   : > { %v1312_v63 = vsel %vm1308_vm11, %v1306_v57, %v1310_v59 }
 0x8dc   : > { %v1311_v62 = vsel %vm1307_vm12, %v1305_v58, %v1309_v6  ;;  %v1314_v2 = vsel %vm407_vm6, %v1312_v63, -9e+15  ;;  %vm1458_vm6 = vcmask 261120  }
 0x8dd   : > { %v1313_v0 = vsel %vm406_vm3, %v1311_v62, -9e+15  ;;  %v1318_v10 = vsel %vm410_vm0, %v1314_v2, -inf }
 0x8de   : > { %v1315_v1 = vsel %vm410_vm0, %v1313_v0, -inf }
 0x8df   : > { %1316 = vmax.xlane.f32.xlu0 %v1315_v1 }
 0x8e3   : > { %1319 = vmax.xlane.f32.xlu0 %v1318_v10 }
 0x96c   : > { %v1317_v3 = vpop.xlane.xlu0 %1316 }
 0x96d   : > { %v1321_v4 = vsub.f32 %v1313_v0, %v1317_v3 }
 0x96f   : > { %v1323_v9 = vmul.f32 1.442695, %v1321_v4  ;;  %v705_v4 = vmin.f32 %v3093_v8, 0.0 }
 0x970   : > { %v1320_v11 = vpop.xlane.xlu0 %1319 }
 0x971   : > { %2577 = vpow2.f32 %v1323_v9  ;;  %v1322_v14 = vsub.f32 %v1314_v2, %v1320_v11  ;;  %v706_v9 = vmin.f32 %v3091_v5, 0.0  ;;  %v707_v11 = vmul.f32 1.442695, %v705_v4 }
 0x973   : > { %v1325_v16 = vmul.f32 1.442695, %v1322_v14  ;;  %v709_v14 = vmul.f32 1.442695, %v706_v9 }
 0x975   : > { %2579 = vpow2.f32 %v1325_v16 }
 0x976   : > { %2581 = vpow2.f32 %v946_v19 }
 0x977   : > { %2583 = vpow2.f32 %v1185_v23 }
 0x978   : > { %2585 = vpow2.f32 %v1187_v28 }
 0x979   : > { %2587 = vpow2.f32 %v948_v31 }
 0x97b   : > { %v2578_v21 = vpop.eup %2577 }
 0x97c   : > { %v1327_v24 = vsel %vm410_vm0, %v2578_v21, 0.0 }
 0x97d   : > { %1328 = vadd.xlane.f32.xlu1 %v1327_v24 }
 0x97f   : > { %v2580_v27 = vpop.eup %2579 }
 0x980   : > { %v1330_v29 = vsel %vm410_vm0, %v2580_v27, 0.0  ;;  %v2582_v32 = vpop.eup %2581 }
 0x981   : > { %1331 = vadd.xlane.f32.xlu0 %v1330_v29  ;;  %v2163_v33 = vadd.f32 -1.0, %v2582_v32  ;;  %v2584_v34 = vpop.eup %2583 }
 0x982   : > { %v2170_v36 = vadd.f32 -1.0, %v2584_v34  ;;  %v2586_v37 = vpop.eup %2585 }
 0x983   : > { %v952_v35 = vsel %vm942_vm13, %v3125_v61, %v2163_v33  ;;  %v2588_v38 = vpop.eup %2587  ;;  %v2171_v40 = vadd.f32 -1.0, %v2586_v37 }
 0x984   : > { %v1191_v39 = vsel %vm1181_vm14, %v1172_v52, %v2170_v36  ;;  %v2164_v41 = vadd.f32 -1.0, %v2588_v38  ;;  %v1469_v52 = vld [vmem:[%s3355_s4 + $0x28] sm:$0xff]  ;;  %v2179_v38 = vld [vmem:[%s3356_s5] ss:$0 sm:$0xff] }
 0x985   : > { %v1192_v42 = vsel %vm1182_vm15, %v3154_v51, %v2171_v40  ;;  %v1468_v51 = vld [vmem:[%s3355_s4 + $0x20] sm:$0xff] }
 0x986   : > { %v953_v61 = vsel %vm943_vm1, %v3123_v60, %v2164_v41  ;;  %v1465_v60 = vld [vmem:[%s3355_s4 + $0x8] sm:$0xff]  ;;  %v2435_v53 = vpack.c.bf16 %v1469_v52, %v1468_v51 }
 0x987   : > { %v2427_v13 = vpack.c.bf16 %v1465_v60, %v1464_v48 }
 0x989   : > { %2428 = vmatprep.subr.bf16.mxu1 %v2427_v13 }
 0x98e   : > { %1434 = vrot.lane.b32.xlu1 %v952_v35, %s2773_s14 }
 0x992   : > { %1442 = vrot.lane.b32.xlu1 %v1191_v39, %s2775_s15 }
 0x996   : > { %1444 = vrot.lane.b32.xlu1 %v1192_v42, %s2775_s15 }
 0x997   : > { %1436 = vrot.lane.b32.xlu0 %v953_v61, %s2773_s14  ;;  %v1727_v61 = vld [vmem:[%s3358_s7] sm:$0xff] }
 0xa0a   : > { %v1329_v43 = vpop.xlane.xlu1 %1328 }
 0xa0b   : > { %2589 = vrcp.f32 %v1329_v43  ;;  %v1728_v43 = vld [vmem:[%s3358_s7 + $0x8] sm:$0xff] }
 0xa0e   : > { %v1332_v44 = vpop.xlane.xlu0 %1331  ;;  %v1435_v16 = vpop.permute.xlu1 %1434 }
 0xa0f   : > { %2591 = vrcp.f32 %v1332_v44 }
 0xa12   : > { %v1443_v17 = vpop.permute.xlu1 %1442  ;;  %v1437_v24 = vpop.permute.xlu0 %1436 }
 0xa15   : > { %v2590_v45 = vpop.eup %2589 }
 0xa16   : > { %v1335_v46 = vmul.f32 %v2590_v45, %v2578_v21  ;;  %v1445_v23 = vpop.permute.xlu1 %1444 }
 0xa18   : > { %2330 = vmatprep.mubr.msk.f32.mxu1 %vm410_vm0, %v1335_v46 }
 0xa19   : > { %v2592_v47 = vpop.eup %2591 }
 0xa1a   : > { %v1336_v18 = vmul.f32 %v2592_v47, %v2580_v27  ;;  %v2451_v47 = vpack.c.bf16 %v1728_v43, %v1727_v61 }
 0xa1c   : > { %2331 = vmatmul.mubr.msk.f32.vlgmr.msra.gmra.mrb[8].mxu1 %vm410_vm0, %v1336_v18  ;;  %v1730_v18 = vld [vmem:[%s3358_s7 + $0x18] sm:$0xff] }
 0xa1d   : > { %2430 = vmatpush3.bf16.msra.mxu1 %v2427_v13 }
 0xa1e   : > { %2432 = vmatprep.subr.bf16.mxu1 %v2431_v50 }
 0xa21   : > { %2434 = vmatpush3.bf16.msra.mxu1 %v2431_v50 }
 0xa22   : > { %2436 = vmatprep.subr.bf16.mxu1 %v2435_v53 }
 0xa25   : > { %2438 = vmatpush3.bf16.msra.mxu1 %v2435_v53 }
 0xa26   : > { %2440 = vmatprep.subr.bf16.mxu1 %v2439_v56 }
 0xa29   : > { %2442 = vmatpush3.bf16.msra.mxu1 %v2439_v56 }
 0xaef   : > { %v2332_v57 = vpop.f32.mrb[8].mxu1 }
 0xaf0   : > { %v1423_v7 = vmin.f32 %v2332_v57, 0.0  ;;  %v1411_v58 = vpop.f32.mrb[9].mxu1  ;;  %vm1421_vm3 = vcmp.gt.f32.partialorder %v2332_v57, 0.0 }
 0xaf1   : > { %v1422_v59 = vmin.f32 %v1411_v58, 0.0  ;;  %vm1420_vm4 = vcmp.gt.f32.partialorder %v1411_v58, 0.0 }
 0xaf2   : > { %v1426_v6 = vmul.f32 1.442695, %v1423_v7 }
 0xaf3   : > { %v1424_v62 = vmul.f32 1.442695, %v1422_v59 }
 0xaf4   : > { %2593 = vpow2.f32 %v1426_v6 }
 0xaf5   : > { %2595 = vpow2.f32 %v1424_v62 }
 0xaf6   : > { %2597 = vpow2.f32 %v707_v11 }
 0xaf7   : > { %2599 = vpow2.f32 %v709_v14 }
 0xafe   : > { %v2594_v63 = vpop.eup %2593 }
 0xaff   : > { %v2596_v0 = vpop.eup %2595  ;;  %v2178_v1 = vadd.f32 -1.0, %v2594_v63 }
 0xb00   : > { %v2177_v2 = vadd.f32 -1.0, %v2596_v0  ;;  %v2598_v19 = vpop.eup %2597 }
 0xb01   : > { %v1431_v10 = vsel %vm1421_vm3, %v2332_v57, %v2178_v1  ;;  %v2600_v20 = vpop.eup %2599  ;;  %v2156_v21 = vadd.f32 -1.0, %v2598_v19 }
 0xb02   : > { %1452 = vrot.lane.b32.xlu1 %v1431_v10, %s2776_s19  ;;  %v1430_v3 = vsel %vm1420_vm4, %v1411_v58, %v2177_v2  ;;  %v2157_v22 = vadd.f32 -1.0, %v2600_v20 }
 0xb03   : > { %1450 = vrot.lane.b32.xlu0 %v1430_v3, %s2776_s19  ;;  %v713_v26 = vsel %vm703_vm5, %v3093_v8, %v2156_v21  ;;  %v1562_v8 = vld [vmem:[%s3357_s6 + $0x8] sm:$0xff]  ;;  %s401_s19 = scalar_lea.vmem [#allocation8], %s2994_s27 }
 0xb04   : > { %v714_v27 = vsel %vm704_vm7, %v3091_v5, %v2157_v22  ;;  %v1456_v28 = vsel %vm410_vm0, %v713_v26, %v1435_v16  ;;  %v1561_v5 = vld [vmem:[%s3357_s6] sm:$0xff]  ;;  %s2007_s20 = sshll.u32 %s401_s19, 4  ;;  %s3258_s20 = int_to_ptr.vmem [resolvable:$true] %s2007_s20 }
 0xb05   : > { %v1459_v31 = vsel %vm1458_vm6, %v1456_v28, %v1443_v17  ;;  %v1457_v32 = vsel %vm410_vm0, %v714_v27, %v1437_v24  ;;  %v2443_v37 = vpack.c.bf16 %v1562_v8, %v1561_v5  ;;  %s2661_s15 = scalar_lea.vmem %s3258_s20, 256  ;;  %p2668_p4 = scmp.lt.s32.totalorder %s3258_s20, %s2666_s26 }
 0xb06   : > { %v1460_v34 = vsel %vm1458_vm6, %v1457_v32, %v1445_v23  ;;  %p2662_p12 = scmp.ne.s32.totalorder %s3258_s20, %s2661_s15  ;;  %p2669_p5 = scmp.lt.s32.totalorder %s2667_s28, %s2661_s15 }
 0xb07   : > { %2444 = vmatprep.subr.bf16.mxu0 %v2443_v37 }
 0xb08   : > { %2446 = vmatpush3.bf16.msra.mxu0 %v2443_v37  ;;  %p2663_p2 = pnand %p2662_p12, %p3387_p0  ;;  %p2670_p10 = por %p2669_p5, %p2668_p4 }
 0xb0a   : > { %p2664_p9 = pneg %p2663_p2 }
 0xb0c   : > { %p2671_p11 = pnand %p2670_p10, %p2664_p9 }
 0xb74   : > { %v1453_v29 = vpop.permute.xlu1 %1452 }
 0xb75   : > { %v1451_v33 = vpop.permute.xlu0 %1450  ;;  %v1463_v36 = vsel %vm1461_vm8, %v1460_v34, %v1453_v29 }
 0xb76   : > { %v1462_v35 = vsel %vm1461_vm8, %v1459_v31, %v1451_v33 }
 0xb77   : > { %2349 = vmatprep.mubr.msk.f32.mxu1 %vm1479_vm9, %v1462_v35 }
 0xb78   : > { %2350 = vmatmul.mubr.msk.f32.vlgmr.msra.gmra.mrb[10].mxu1 %vm1479_vm9, %v1463_v36 }
 0xb79   : > { %2381 = vmatprep.mubr.msk.f32.mxu1 %vm410_vm0, %v3053_v25 }
 0xc4b   : > { %v2351_v39 = vpop.f32.mrb[10].mxu1 }
 0xc4c   : > { %v1552_v40 = vpop.f32.mrb[11].mxu1  ;;  %v1558_v42 = vadd.f32 %v2351_v39, %v2179_v38 }
 0xc4d   : > { %v1553_v41 = vadd.f32 %v2179_v38, %v1552_v40 }
 0xc4f   : > { %2356 = vmatprep.mubr.msk.f32.mxu0 %vm410_vm0, %v1553_v41 }
 0xc50   : > { %2357 = vmatmul.mubr.msk.f32.vlgmr.msra.gmra.mrb[8].mxu0 %vm410_vm0, %v1558_v42 }
 0xc51   : > { %2363 = vmatprep.mubr.msk.f32.mxu0 %vm410_vm0, %v3053_v25  ;;  %v1729_v25 = vld [vmem:[%s3358_s7 + $0x10] sm:$0xff] }
 0xc52   : > { %v2455_v48 = vpack.c.bf16 %v1730_v18, %v1729_v25 }
 0xd23   : > { %v2358_v44 = vpop.f32.mrb[8].mxu0 }
 0xd24   : > { %v1635_v45 = vpop.f32.mrb[9].mxu0 }
 0xd25   : > { %v2447_v46 = vpack.c.bf16 %v2358_v44, %v1635_v45 }
 0xd27   : > { %2448 = vmatprep.subr.bf16.mxu0 %v2447_v46 }
 0xd28   : > { %2450 = vmatpush3.bf16.msra.mxu0 %v2447_v46 }
 0xd29   : > { %2452 = vmatprep.subr.bf16.mxu0 %v2451_v47 }
 0xd2b   : > { %2364 = vmatmul.mubr.msk.f32.vlgmr.msra.gmra.mrb[10].mxu0 %vm410_vm0, %v3058_v30 }
 0xd2c   : > { %2454 = vmatpush3.bf16.msra.mxu0 %v2451_v47 }
 0xd2d   : > { %2456 = vmatprep.subr.bf16.mxu0 %v2455_v48 }
 0xd30   : > { %2458 = vmatpush3.bf16.msra.mxu0 %v2455_v48 }
 0xdfe   : > { %v2365_v60 = vpop.f32.mrb[10].mxu0 }
 0xdff   : > { %v1716_v12 = vpop.f32.mrb[11].mxu0  ;;  %v1726_v49 = vmax.f32 %v2365_v60, 0.0 }
 0xe00   : > { %v1725_v13 = vmax.f32 %v1716_v12, 0.0 }
 0xe02   : > { %2374 = vmatprep.mubr.msk.f32.mxu0 %vm1458_vm6, %v1725_v13 }
 0xe03   : > { %2375 = vmatmul.mubr.msk.f32.vlgmr.msra.gmra.mrb[12].mxu0 %vm1458_vm6, %v1726_v49 }
 0xed6   : > { %v2376_v50 = vpop.f32.mrb[12].mxu0 }
 0xed7   : > { %v1803_v51 = vpop.f32.mrb[13].mxu0 }
 0xed8   : > { %v2459_v52 = vpack.c.bf16 %v2376_v50, %v1803_v51 }
 0xeda   : > { %2460 = vmatprep.subr.bf16.mxu1 %v2459_v52 }
 0xedb   : > { %2462 = vmatpush3.bf16.msra.mxu1 %v2459_v52 }
 0xede   : > { %2382 = vmatmul.mubr.msk.f32.vlgmr.msra.gmra.mrb[12].mxu1 %vm410_vm0, %v3058_v30 }
 0xfb1   : > { %v2383_v53 = vpop.f32.mrb[12].mxu1 }
 0xfb2   : > { %1888 = vst.msk [vmem:[%s401_s19 + $0x8] sm:$0xff] %vm1458_vm6, %v2383_v53  ;;  %v1878_v54 = vpop.f32.mrb[13].mxu1 }
 0xfb3   : > { %1887 = vst.msk [vmem:[%s401_s19] sm:$0xff] %vm1458_vm6, %v1878_v54  ;;  %v2463_v55 = vpack.c.bf16 %v2383_v53, %v1878_v54  ;;  %2388 = vmatprep.mubr.msk.f32.mxu0 %vm410_vm0, %v1878_v54 }
 0xfb5   : > { %2465 = vmatprep.subr.msk.bf16.mxu0 %vm3033_vm2, %v2463_v55 }
 0xfb6   : > { %2468 = vmatpush3.bf16.xpose.msk.msra.mxu0 %vm3033_vm2, %v2463_v55 }
 0xfbd   : > { %2389 = vmatmul.mubr.msk.f32.vlgmr.msra.gmra.mrb[14].mxu0 %vm410_vm0, %v2383_v53 }
 0xfbe   : > { %2674 = shalt.err (!%p2671_p11)
}
 0xfbf   : > { %s2675_s11 = scalar_lea.hbm %s3266_s24, 256  ;;  %s2679_s19 = scalar_lea.hbm %s3360_s9, 2048 }
 0xfc0   : > { %p2676_p7 = scmp.ne.s32.totalorder %s3266_s24, %s2675_s11  ;;  %p2680_p1 = scmp.lt.u32.totalorder %s3266_s24, %s3360_s9 }
 0xfc1   : > { %p2681_p3 = scmp.lt.u32.totalorder %s2679_s19, %s2675_s11  ;;  %p2683_p12 = scmp.lt.u32.totalorder %s2675_s11, %s3266_s24 }
 0xfc2   : > { %p2677_p8 = pnand %p2676_p7, %p3387_p0 }
 0xfc3   : > { %p2682_p6 = por %p2681_p3, %p2680_p1 }
 0xfc4   : > { %p2678_p13 = pneg %p2677_p8 }
 0xfc5   : > { %p2684_p2 = por %p2683_p12, %p2682_p6 }
 0xfc7   : > { %p2685_p9 = pnand %p2684_p2, %p2678_p13 }
 0xfc9   : > { %2688 = shalt.err (!%p2685_p9)
}
 0xfca   : > { %s2779_s15 = smov 128   ;;  %s2780_s23 = smov 8  }
 0xfcb   : > { %2474 = dma.vmem_to_hbm [thread:$0]  (%p3387_p0), %s3258_s20, 256, %s3266_s24, %s1978_s0, %s2779_s15, %s2779_s15, %s2780_s23  }
 0xfcc   : > { %s394_s26 = scalar_lea.vmem [#allocation7], %s2994_s27  ;;  %s3303_s17 = scalar_lea.hbm %s3359_s8, %s2204_s25 }
 0xfcd   : > { %s1991_s28 = sshll.u32 %s394_s26, 4  ;;  %s1973_s20 = scalar_lea.sflag [#allocation4], %s2991_s29  ;;  %s3296_s28 = int_to_ptr.vmem [resolvable:$true] %s1991_s28 }
 0xfce   : > { %s2689_s27 = scalar_lea.vmem %s3296_s28, 256  ;;  %s2781_s24 = smov [#allocation7]  }
 0xfcf   : > { %p2690_p4 = scmp.ne.s32.totalorder %s3296_s28, %s2689_s27  ;;  %s2693_s0 = sshll.u32 %s2781_s24, 4  ;;  %s2694_s0 = int_to_ptr.vmem [resolvable:$false] %s2693_s0 }
 0xfd0   : > { %s2695_s13 = scalar_lea.vmem %s2694_s0, 512  ;;  %p2696_p11 = scmp.lt.s32.totalorder %s3296_s28, %s2694_s0 }
 0xfd1   : > { %p2691_p5 = pnand %p2690_p4, %p3387_p0  ;;  %p2697_p7 = scmp.lt.s32.totalorder %s2695_s13, %s2689_s27 }
 0xfd3   : > { %p2692_p10 = pneg %p2691_p5  ;;  %p2698_p8 = por %p2697_p7, %p2696_p11 }
 0xfd5   : > { %p2699_p13 = pnand %p2698_p8, %p2692_p10 }
0x1090   : > { %v2390_v15 = vpop.f32.mrb[14].mxu0 }
0x1091   : > { %1971 = vst.msk [vmem:[%s394_s26 + $0x8] sm:$0xff] %vm410_vm0, %v2390_v15  ;;  %v1961_v30 = vpop.f32.mrb[15].mxu0 }
0x1092   : > { %1970 = vst.msk [vmem:[%s394_s26] sm:$0xff] %vm410_vm0, %v1961_v30 }
0x1093   : > { %2702 = shalt.err (!%p2699_p13)
}
0x1094   : > { %s2703_s25 = scalar_lea.hbm %s3303_s17, 256  ;;  %s2707_s16 = scalar_lea.hbm %s3359_s8, 2048 }
0x1095   : > { %p2704_p1 = scmp.ne.s32.totalorder %s3303_s17, %s2703_s25  ;;  %p2708_p12 = scmp.lt.u32.totalorder %s3303_s17, %s3359_s8 }
0x1096   : > { %p2709_p2 = scmp.lt.u32.totalorder %s2707_s16, %s2703_s25  ;;  %p2711_p4 = scmp.lt.u32.totalorder %s2703_s25, %s3303_s17 }
0x1097   : > { %p2705_p3 = pnand %p2704_p1, %p3387_p0 }
0x1098   : > { %p2710_p9 = por %p2709_p2, %p2708_p12 }
0x1099   : > { %p2706_p6 = pneg %p2705_p3 }
0x109a   : > { %p2712_p5 = por %p2711_p4, %p2710_p9 }
0x109c   : > { %p2713_p10 = pnand %p2712_p5, %p2706_p6 }
0x109e   : > { %2716 = shalt.err (!%p2713_p10)
}
0x109f   : > { %2473 = dma.vmem_to_hbm [thread:$0]  (%p3387_p0), %s3296_s28, 256, %s3303_s17, %s1973_s20, %s2779_s15, %s2779_s15, %s2780_s23  }
0x10a0 PF: > { %p2492_p11 = scmp.ge.s32.totalorder %s2763_s12, 2  ;;  %s2022_s18 = sand.u32 1, %s2751_s30  }
0x10a1   : > { %p3388_p7 = scmp.ne.s32.totalorder %s3376_s22, 0  ;;  %s2023_s27 = scalar_lea.sflag [#allocation4], %s2022_s18 }
0x10a3   : > { %p2485_p8 = pnand %p2492_p11, %p3388_p7 }
0x10a5   : > { %2742 = dma.done.wait (!%p2485_p8), %s2023_s27, 256  }
0x10a6   : > { %2744 = vsyncadd (!%p2485_p8), %s2023_s27, 4294967040  ;;  %s2032_s21 = scalar_lea.sflag [#allocation9], %s2022_s18 }
0x10a7   : > { %2746 = dma.done.wait (!%p2485_p8), %s2032_s21, 256  }
0x10a8   : > { %2748 = vsyncadd (!%p2485_p8), %s2032_s21, 4294967040  ;;  %s3389_s12 = sld [smem:[#allocation15_spill]]  ;;  %s3390_s29 = sld [smem:[#allocation14_spill]] }
0x10a9   : > { %s3391_s11 = sld [smem:[#allocation16_spill]]  ;;  %s3392_s30 = smov %s2755_s10 }
0x10ae   : > { %p29_p0 = scmp.ge.s32.totalorder %s3389_s12, 10   ;;  %s3393_s10 = smov %s3390_s29 }
0x10b0   :  { %31 = sbr.rel (!%p29_p0) target bundleno = 11 (0xb), region = 127 }
0x10b7   :  { %2037 = vsyncpa [#allocation3], 1 }
0x10b8   :  { %2039 = vsyncpa [#allocation3 + $0x1], 1 }
0x10b9   :  { %2040 = vsyncpa [#allocation6], 1 }
0x10ba   :  { %2042 = vsyncpa [#allocation6 + $0x1], 1 }
0x10bb   :  { %2043 = vsyncpa [#allocation4], 1 }
0x10bc   :  { %2045 = vsyncpa [#allocation4 + $0x1], 1 }
0x10bd   :  { %2046 = vsyncpa [#allocation9], 1 }
0x10be   :  { %2048 = vsyncpa [#allocation9 + $0x1], 1 }

</bundles_post_ra>
